<compile_context>
chip_gen: v6e
topology: v6e:2x2x1
jax: 0.10.0
libtpu: 0.0.40
codegen_flags: <defaults>
</compile_context>

<pallas_src>
import functools

import jax
import jax.numpy as jnp
from jax.experimental import pallas as pl
from jax.experimental.pallas import tpu as pltpu

N_EMBD = 96                    # true feature width (as in the PyTorch module)
N_HEAD = 3
HEAD_SIZE = N_EMBD // N_HEAD   # 32
HIDDEN = 4 * N_EMBD            # 384 (already a multiple of 128)
BLOCK_SIZE = 96
LN_EPS = 1e-5

LANE = 128
SUBLANE = 8
C_PAD = ((N_EMBD + LANE - 1) // LANE) * LANE            # 96  -> 128
QKV_DIM = N_HEAD * HEAD_SIZE                            # 96
QKV_PAD = ((3 * QKV_DIM + LANE - 1) // LANE) * LANE     # 288 -> 384


def _round_up(a, b):
    return ((a + b - 1) // b) * b


def _pad_to(a, shape):
    return jnp.pad(a, [(0, t - s) for s, t in zip(a.shape, shape)])


def _layernorm(x, gamma, beta, c_true):
    """LayerNorm over the first `c_true` lanes of a zero-padded feature dim (f32)."""
    mean = jnp.sum(x, axis=-1, keepdims=True) * (1.0 / c_true)
    diff = x - mean
    col = jax.lax.broadcasted_iota(jnp.int32, x.shape, x.ndim - 1)
    diff = jnp.where(col < c_true, diff, 0.0)            # ignore padded lanes
    var = jnp.sum(diff * diff, axis=-1, keepdims=True) * (1.0 / c_true)
    return diff * jax.lax.rsqrt(var + LN_EPS) * gamma + beta


# ---------------------------------------------------------------------------
# Fused kernel: out = x + FFN(LN2(x + MHA(LN1(x)))), Bt sequences per step.
# Row tile is (Bt*Tp, Cp); sequences live at static row offsets b*Tp.
# ---------------------------------------------------------------------------
def block_kernel(x_ref, g1_ref, be1_ref, wqkv_ref, wo_ref, bo_ref,
                 g2_ref, be2_ref, w1_ref, b1_ref, w2_ref, b2_ref, o_ref,
                 *, c_true, n_head, head_size, n_seq, t_pad):
    f32, bf16 = jnp.float32, jnp.bfloat16
    qkv_dim = n_head * head_size

    x = x_ref[...]                                       # (Bt*Tp, Cp) f32, pad cols 0

    # ---- LN1 + fused QKV projection (n_embd**-0.5 already folded into Wq) ----
    y = _layernorm(x, g1_ref[...], be1_ref[...], c_true).astype(bf16)
    qkv = jnp.dot(y, wqkv_ref[...], preferred_element_type=f32)   # (rows, 384)

    # causal (tril) mask, shared by every sequence/head in this tile
    row = jax.lax.broadcasted_iota(jnp.int32, (t_pad, t_pad), 0)
    col = jax.lax.broadcasted_iota(jnp.int32, (t_pad, t_pad), 1)
    causal = col <= row

    # ---- per-sequence causal attention (static unroll; n_seq*n_head <= 24) ----
    seq_outs = []
    for b in range(n_seq):
        r0 = b * t_pad
        head_outs = []
        for h in range(n_head):
            q = qkv[r0:r0 + t_pad, h * head_size:(h + 1) * head_size]
            k = qkv[r0:r0 + t_pad,
                    qkv_dim + h * head_size:qkv_dim + (h + 1) * head_size]
            v = qkv[r0:r0 + t_pad,
                    2 * qkv_dim + h * head_size:2 * qkv_dim + (h + 1) * head_size]
            wei = jax.lax.dot_general(
                q.astype(bf16), k.astype(bf16),
                (((1,), (1,)), ((), ())),
                preferred_element_type=f32)              # (Tp, Tp), scale pre-folded
            wei = jnp.where(causal, wei, -jnp.inf)
            p = jnp.exp(wei - jnp.max(wei, axis=-1, keepdims=True))
            p = p * pl.reciprocal(jnp.sum(p, axis=-1, keepdims=True), approx=True)
            # attention-weight dropout: identity in eval mode
            head_outs.append(jnp.dot(p.astype(bf16), v.astype(bf16),
                                     preferred_element_type=f32))  # (Tp, hs)
        seq_outs.append(jnp.concatenate(head_outs, axis=-1))        # (Tp, 96)
    attn_cat = jnp.concatenate(seq_outs, axis=0)                    # (rows, 96)

    # ---- fused output projection (single K=96 matmul) + residual 1 ----
    sa = jnp.dot(attn_cat.astype(bf16), wo_ref[...],
                 preferred_element_type=f32) + bo_ref[...]
    # projection dropout: identity in eval mode
    x1 = x + sa

    # ---- LN2 + FFN + residual 2 ----
    y2 = _layernorm(x1, g2_ref[...], be2_ref[...], c_true).astype(bf16)
    h1 = jnp.dot(y2, w1_ref[...], preferred_element_type=f32) + b1_ref[...]
    h1 = jnp.maximum(h1, 0.0)                            # ReLU in f32
    f = jnp.dot(h1.astype(bf16), w2_ref[...], preferred_element_type=f32) + b2_ref[...]
    # FFN-output dropout: identity in eval mode
    o_ref[...] = (x1 + f).astype(o_ref.dtype)


def block_forward(x, params, *, max_seqs_per_step=8, target_rows=256):
    """Forward pass of the PyTorch `Block` in eval mode. x: [B, T, C] -> [B, T, C]."""
    B, T, C = x.shape
    assert C == N_EMBD and T <= BLOCK_SIZE
    f32, bf16 = jnp.float32, jnp.bfloat16
    Cp, H = C_PAD, HIDDEN

    # tile geometry: Tp sublane-aligned, Bt sequences per grid step
    Tp = _round_up(T, SUBLANE)
    Bt = max(1, min(max_seqs_per_step, B, max(1, target_rows // Tp)))
    Bp = _round_up(B, Bt)
    tile_rows = Bt * Tp

    scale = float(C) ** -0.5                             # PyTorch scales by n_embd**-0.5

    # activations: (B,T,C) -> zero-pad -> (Bp*Tp, Cp)
    xp = _pad_to(x.astype(f32), (Bp, Tp, Cp)).reshape(Bp * Tp, Cp)

    # LayerNorm params (padded lanes are zero so in-kernel masking stays exact)
    g1 = _pad_to(params["ln1_g"].reshape(1, C), (1, Cp))
    be1 = _pad_to(params["ln1_b"].reshape(1, C), (1, Cp))
    g2 = _pad_to(params["ln2_g"].reshape(1, C), (1, Cp))
    be2 = _pad_to(params["ln2_b"].reshape(1, C), (1, Cp))

    # fused QKV weight [Q | K | V] (per-head concat), scale folded into Q
    q_cat = jnp.concatenate([params["wq"][h] * scale for h in range(N_HEAD)], axis=-1)
    k_cat = jnp.concatenate([params["wk"][h] for h in range(N_HEAD)], axis=-1)
    v_cat = jnp.concatenate([params["wv"][h] for h in range(N_HEAD)], axis=-1)
    wqkv = _pad_to(jnp.concatenate([q_cat, k_cat, v_cat], axis=-1),
                   (Cp, QKV_PAD)).astype(bf16)

    # fused output projection: (n_head*hs, C) -> pad output lanes to Cp
    wo = _pad_to(params["wo"].reshape(QKV_DIM, C), (QKV_DIM, Cp)).astype(bf16)
    bo = _pad_to(params["bo"].reshape(1, C), (1, Cp))

    w1 = _pad_to(params["w1"], (Cp, H)).astype(bf16)
    b1 = params["b1"].reshape(1, H).astype(f32)
    w2 = _pad_to(params["w2"], (H, Cp)).astype(bf16)
    b2 = _pad_to(params["b2"].reshape(1, C), (1, Cp))

    kernel = functools.partial(
        block_kernel, c_true=C, n_head=N_HEAD, head_size=HEAD_SIZE,
        n_seq=Bt, t_pad=Tp)

    const = lambda i: (0, 0)
    out = pl.pallas_call(
        kernel,
        out_shape=jax.ShapeDtypeStruct((Bp * Tp, Cp), f32),
        grid_spec=pltpu.PrefetchScalarGridSpec(
            num_scalar_prefetch=0,
            grid=(Bp // Bt,),
            in_specs=[
                pl.BlockSpec((tile_rows, Cp), lambda i: (i, 0)),   # x row tile
                pl.BlockSpec((1, Cp), const),                      # ln1 gamma
                pl.BlockSpec((1, Cp), const),                      # ln1 beta
                pl.BlockSpec((Cp, QKV_PAD), const),                # Wqkv   (resident)
                pl.BlockSpec((QKV_DIM, Cp), const),                # Wproj  (resident)
                pl.BlockSpec((1, Cp), const),                      # bproj
                pl.BlockSpec((1, Cp), const),                      # ln2 gamma
                pl.BlockSpec((1, Cp), const),                      # ln2 beta
                pl.BlockSpec((Cp, H), const),                      # W1     (resident)
                pl.BlockSpec((1, H), const),                       # b1
                pl.BlockSpec((H, Cp), const),                      # W2     (resident)
                pl.BlockSpec((1, Cp), const),                      # b2
            ],
            out_specs=pl.BlockSpec((tile_rows, Cp), lambda i: (i, 0)),
        ),
        compiler_params=pltpu.CompilerParams(
            dimension_semantics=("parallel",)),
    )(xp, g1, be1, wqkv, wo, bo, g2, be2, w1, b1, w2, b2)

    return out.reshape(Bp, Tp, Cp)[:B, :T, :C]


def init_params(key, n_embd=N_EMBD):
    """Mirrors torch defaults: Linear ~ U[-1/sqrt(fan_in), +]; LayerNorm gamma=1, beta=0."""
    ks = jax.random.split(key, 9)
    h = 4 * n_embd
    b_c = 1.0 / float(n_embd) ** 0.5
    b_h = 1.0 / float(h) ** 0.5
    u = lambda k, shape, bound: jax.random.uniform(k, shape, jnp.float32, -bound, bound)
    return {
        "ln1_g": jnp.ones((n_embd,), jnp.float32),
        "ln1_b": jnp.zeros((n_embd,), jnp.float32),
        "wq": u(ks[0], (N_HEAD, n_embd, HEAD_SIZE), b_c),
        "wk": u(ks[1], (N_HEAD, n_embd, HEAD_SIZE), b_c),
        "wv": u(ks[2], (N_HEAD, n_embd, HEAD_SIZE), b_c),
        "wo": u(ks[3], (N_HEAD, HEAD_SIZE, n_embd), b_c),   # proj weight, per-head split
        "bo": u(ks[4], (n_embd,), b_c),
        "ln2_g": jnp.ones((n_embd,), jnp.float32),
        "ln2_b": jnp.zeros((n_embd,), jnp.float32),
        "w1": u(ks[5], (n_embd, h), b_c),
        "b1": u(ks[6], (h,), b_c),
        "w2": u(ks[7], (h, n_embd), b_h),
        "b2": u(ks[8], (n_embd,), b_h),
    }


def ref_block(x, p):
    """Pure-JAX f32 reference of the PyTorch Block forward (eval mode)."""
    def ln(v, g, b):
        m = jnp.mean(v, axis=-1, keepdims=True)
        var = jnp.mean((v - m) ** 2, axis=-1, keepdims=True)
        return (v - m) / jnp.sqrt(var + LN_EPS) * g + b

    B, T, C = x.shape
    y = ln(x, p["ln1_g"], p["ln1_b"])
    tril = jnp.tril(jnp.ones((T, T), dtype=bool))
    sa = jnp.zeros_like(x)
    for h in range(N_HEAD):
        q = y @ p["wq"][h]
        k = y @ p["wk"][h]
        v = y @ p["wv"][h]
        wei = jnp.einsum("btd,bsd->bts", q, k) * (C ** -0.5)
        wei = jnp.where(tril, wei, -jnp.inf)
        wei = jax.nn.softmax(wei, axis=-1)
        sa = sa + (wei @ v) @ p["wo"][h]
    x = x + sa + p["bo"]
    y2 = ln(x, p["ln2_g"], p["ln2_b"])
    ff = jnp.maximum(y2 @ p["w1"] + p["b1"], 0.0) @ p["w2"] + p["b2"]
    return x + ff


if __name__ == "__main__":
    key = jax.random.PRNGKey(0)
    kx, kp = jax.random.split(key)

    B, T, C = 2, 8, N_EMBD
    x = jax.random.normal(kx, (B, T, C), jnp.float32)
    params = init_params(kp)

    out = block_forward(x, params)
    out = jax.block_until_ready(out)

    ref = ref_block(x, params)
    assert out.shape == (B, T, C)
    # bf16 MXU operands with f32 accumulation vs. pure-f32 reference
    assert jnp.allclose(out, ref, atol=2e-2, rtol=2e-2), float(jnp.max(jnp.abs(out - ref)))

    print("KERNEL_OK")
</pallas_src>

<mosaic_0001>
module attributes {stable_mosaic.version = 11 : i64} {
  func.func @block_kernel(%arg0: i32, %arg1: memref<16x128xf32, #tpu.memory_space<vmem>>, %arg2: memref<1x128xf32, #tpu.memory_space<vmem>>, %arg3: memref<1x128xf32, #tpu.memory_space<vmem>>, %arg4: memref<128x384xbf16, #tpu.memory_space<vmem>>, %arg5: memref<96x128xbf16, #tpu.memory_space<vmem>>, %arg6: memref<1x128xf32, #tpu.memory_space<vmem>>, %arg7: memref<1x128xf32, #tpu.memory_space<vmem>>, %arg8: memref<1x128xf32, #tpu.memory_space<vmem>>, %arg9: memref<128x384xbf16, #tpu.memory_space<vmem>>, %arg10: memref<1x384xf32, #tpu.memory_space<vmem>>, %arg11: memref<384x128xbf16, #tpu.memory_space<vmem>>, %arg12: memref<1x128xf32, #tpu.memory_space<vmem>>, %arg13: memref<16x128xf32, #tpu.memory_space<vmem>>) attributes {dimension_semantics = [#tpu.dimension_semantics<parallel>], iteration_bounds = array<i64: 1>, scalar_prefetch = 0 : i64, scratch_operands = 0 : i64, tpu.core_type = #tpu.core_type<tc>, window_params = [{transform_indices = @transform_0, window_bounds = array<i64: 16, 128>}, {pipeline_mode = #tpu.pipeline_mode<synchronous>, transform_indices = @transform_1, window_bounds = array<i64: 1, 128>}, {pipeline_mode = #tpu.pipeline_mode<synchronous>, transform_indices = @transform_2, window_bounds = array<i64: 1, 128>}, {pipeline_mode = #tpu.pipeline_mode<synchronous>, transform_indices = @transform_3, window_bounds = array<i64: 128, 384>}, {pipeline_mode = #tpu.pipeline_mode<synchronous>, transform_indices = @transform_4, window_bounds = array<i64: 96, 128>}, {pipeline_mode = #tpu.pipeline_mode<synchronous>, transform_indices = @transform_5, window_bounds = array<i64: 1, 128>}, {pipeline_mode = #tpu.pipeline_mode<synchronous>, transform_indices = @transform_6, window_bounds = array<i64: 1, 128>}, {pipeline_mode = #tpu.pipeline_mode<synchronous>, transform_indices = @transform_7, window_bounds = array<i64: 1, 128>}, {pipeline_mode = #tpu.pipeline_mode<synchronous>, transform_indices = @transform_8, window_bounds = array<i64: 128, 384>}, {pipeline_mode = #tpu.pipeline_mode<synchronous>, transform_indices = @transform_9, window_bounds = array<i64: 1, 384>}, {pipeline_mode = #tpu.pipeline_mode<synchronous>, transform_indices = @transform_10, window_bounds = array<i64: 384, 128>}, {pipeline_mode = #tpu.pipeline_mode<synchronous>, transform_indices = @transform_11, window_bounds = array<i64: 1, 128>}, {transform_indices = @transform_12, window_bounds = array<i64: 16, 128>}]} {
    %c0 = arith.constant 0 : index
    %c0_0 = arith.constant 0 : index
    %0 = vector.load %arg1[%c0, %c0_0] : memref<16x128xf32, #tpu.memory_space<vmem>>, vector<16x128xf32>
    %c0_1 = arith.constant 0 : index
    %c0_2 = arith.constant 0 : index
    %1 = vector.load %arg2[%c0_1, %c0_2] : memref<1x128xf32, #tpu.memory_space<vmem>>, vector<1x128xf32>
    %c0_3 = arith.constant 0 : index
    %c0_4 = arith.constant 0 : index
    %2 = vector.load %arg3[%c0_3, %c0_4] : memref<1x128xf32, #tpu.memory_space<vmem>>, vector<1x128xf32>
    %cst = arith.constant dense<0.000000e+00> : vector<16xf32>
    %3 = vector.multi_reduction <add>, %0, %cst [1] : vector<16x128xf32> to vector<16xf32>
    %4 = vector.shape_cast %3 : vector<16xf32> to vector<16x1xf32>
    %cst_5 = arith.constant 0.010416667 : f32
    %5 = vector.broadcast %cst_5 : f32 to vector<16x1xf32>
    %6 = arith.mulf %4, %5 : vector<16x1xf32>
    %7 = vector.broadcast %6 : vector<16x1xf32> to vector<16x128xf32>
    %8 = arith.subf %0, %7 : vector<16x128xf32>
    %9 = tpu.iota {dimensions = array<i32: 1>} : vector<16x128xi32>
    %c96_i32 = arith.constant 96 : i32
    %10 = vector.broadcast %c96_i32 : i32 to vector<16x128xi32>
    %11 = arith.cmpi slt, %9, %10 : vector<16x128xi32>
    %cst_6 = arith.constant 0.000000e+00 : f32
    %12 = vector.broadcast %cst_6 : f32 to vector<16x128xf32>
    %13 = arith.select %11, %8, %12 : vector<16x128xi1>, vector<16x128xf32>
    %14 = arith.mulf %13, %13 : vector<16x128xf32>
    %cst_7 = arith.constant dense<0.000000e+00> : vector<16xf32>
    %15 = vector.multi_reduction <add>, %14, %cst_7 [1] : vector<16x128xf32> to vector<16xf32>
    %16 = vector.shape_cast %15 : vector<16xf32> to vector<16x1xf32>
    %cst_8 = arith.constant 0.010416667 : f32
    %17 = vector.broadcast %cst_8 : f32 to vector<16x1xf32>
    %18 = arith.mulf %16, %17 : vector<16x1xf32>
    %cst_9 = arith.constant 9.99999974E-6 : f32
    %19 = vector.broadcast %cst_9 : f32 to vector<16x1xf32>
    %20 = arith.addf %18, %19 : vector<16x1xf32>
    %21 = math.rsqrt %20 : vector<16x1xf32>
    %22 = vector.broadcast %21 : vector<16x1xf32> to vector<16x128xf32>
    %23 = arith.mulf %13, %22 : vector<16x128xf32>
    %24 = vector.broadcast %1 : vector<1x128xf32> to vector<16x128xf32>
    %25 = arith.mulf %23, %24 : vector<16x128xf32>
    %26 = vector.broadcast %2 : vector<1x128xf32> to vector<16x128xf32>
    %27 = arith.addf %25, %26 : vector<16x128xf32>
    %28 = arith.truncf %27 : vector<16x128xf32> to vector<16x128xbf16>
    %c0_10 = arith.constant 0 : index
    %c0_11 = arith.constant 0 : index
    %29 = vector.load %arg4[%c0_10, %c0_11] : memref<128x384xbf16, #tpu.memory_space<vmem>>, vector<128x384xbf16>
    %cst_12 = arith.constant dense<0.000000e+00> : vector<16x384xf32>
    %30 = tpu.matmul %28, %29, %cst_12 {dimension_numbers = #tpu.dot_dimension_numbers<[1], [0], [0], [1], [0, 0, 1, 1], [], []>} : vector<16x128xbf16>, vector<128x384xbf16>, vector<16x384xf32> -> vector<16x384xf32>
    %31 = tpu.iota {dimensions = array<i32: 0>} : vector<8x8xi32>
    %32 = tpu.iota {dimensions = array<i32: 1>} : vector<8x8xi32>
    %33 = arith.cmpi sle, %32, %31 : vector<8x8xi32>
    %34 = vector.extract_strided_slice %30 {offsets = [0, 0], sizes = [8, 32], strides = [1, 1]} : vector<16x384xf32> to vector<8x32xf32>
    %35 = vector.extract_strided_slice %30 {offsets = [0, 96], sizes = [8, 32], strides = [1, 1]} : vector<16x384xf32> to vector<8x32xf32>
    %36 = vector.extract_strided_slice %30 {offsets = [0, 192], sizes = [8, 32], strides = [1, 1]} : vector<16x384xf32> to vector<8x32xf32>
    %37 = arith.truncf %34 : vector<8x32xf32> to vector<8x32xbf16>
    %38 = arith.truncf %35 : vector<8x32xf32> to vector<8x32xbf16>
    %cst_13 = arith.constant dense<0.000000e+00> : vector<8x8xf32>
    %39 = tpu.matmul %37, %38, %cst_13 {dimension_numbers = #tpu.dot_dimension_numbers<[1], [1], [0], [0], [0, 0, 1, 0], [], []>} : vector<8x32xbf16>, vector<8x32xbf16>, vector<8x8xf32> -> vector<8x8xf32>
    %cst_14 = arith.constant 0xFF800000 : f32
    %40 = vector.broadcast %cst_14 : f32 to vector<8x8xf32>
    %41 = arith.select %33, %39, %40 : vector<8x8xi1>, vector<8x8xf32>
    %cst_15 = arith.constant dense<0xFF800000> : vector<8xf32>
    %42 = vector.multi_reduction <maximumf>, %41, %cst_15 [1] : vector<8x8xf32> to vector<8xf32>
    %43 = vector.shape_cast %42 : vector<8xf32> to vector<8x1xf32>
    %44 = vector.broadcast %43 : vector<8x1xf32> to vector<8x8xf32>
    %45 = arith.subf %41, %44 : vector<8x8xf32>
    %46 = math.exp %45 : vector<8x8xf32>
    %cst_16 = arith.constant dense<0.000000e+00> : vector<8xf32>
    %47 = vector.multi_reduction <add>, %46, %cst_16 [1] : vector<8x8xf32> to vector<8xf32>
    %48 = vector.shape_cast %47 : vector<8xf32> to vector<8x1xf32>
    %49 = tpu.reciprocal %48 {approx = true} : vector<8x1xf32> -> vector<8x1xf32>
    %50 = vector.broadcast %49 : vector<8x1xf32> to vector<8x8xf32>
    %51 = arith.mulf %46, %50 : vector<8x8xf32>
    %52 = arith.truncf %51 : vector<8x8xf32> to vector<8x8xbf16>
    %53 = arith.truncf %36 : vector<8x32xf32> to vector<8x32xbf16>
    %cst_17 = arith.constant dense<0.000000e+00> : vector<8x32xf32>
    %54 = tpu.matmul %52, %53, %cst_17 {dimension_numbers = #tpu.dot_dimension_numbers<[1], [0], [0], [1], [0, 0, 1, 1], [], []>} : vector<8x8xbf16>, vector<8x32xbf16>, vector<8x32xf32> -> vector<8x32xf32>
    %55 = vector.extract_strided_slice %30 {offsets = [0, 32], sizes = [8, 32], strides = [1, 1]} : vector<16x384xf32> to vector<8x32xf32>
    %56 = vector.extract_strided_slice %30 {offsets = [0, 128], sizes = [8, 32], strides = [1, 1]} : vector<16x384xf32> to vector<8x32xf32>
    %57 = vector.extract_strided_slice %30 {offsets = [0, 224], sizes = [8, 32], strides = [1, 1]} : vector<16x384xf32> to vector<8x32xf32>
    %58 = arith.truncf %55 : vector<8x32xf32> to vector<8x32xbf16>
    %59 = arith.truncf %56 : vector<8x32xf32> to vector<8x32xbf16>
    %cst_18 = arith.constant dense<0.000000e+00> : vector<8x8xf32>
    %60 = tpu.matmul %58, %59, %cst_18 {dimension_numbers = #tpu.dot_dimension_numbers<[1], [1], [0], [0], [0, 0, 1, 0], [], []>} : vector<8x32xbf16>, vector<8x32xbf16>, vector<8x8xf32> -> vector<8x8xf32>
    %cst_19 = arith.constant 0xFF800000 : f32
    %61 = vector.broadcast %cst_19 : f32 to vector<8x8xf32>
    %62 = arith.select %33, %60, %61 : vector<8x8xi1>, vector<8x8xf32>
    %cst_20 = arith.constant dense<0xFF800000> : vector<8xf32>
    %63 = vector.multi_reduction <maximumf>, %62, %cst_20 [1] : vector<8x8xf32> to vector<8xf32>
    %64 = vector.shape_cast %63 : vector<8xf32> to vector<8x1xf32>
    %65 = vector.broadcast %64 : vector<8x1xf32> to vector<8x8xf32>
    %66 = arith.subf %62, %65 : vector<8x8xf32>
    %67 = math.exp %66 : vector<8x8xf32>
    %cst_21 = arith.constant dense<0.000000e+00> : vector<8xf32>
    %68 = vector.multi_reduction <add>, %67, %cst_21 [1] : vector<8x8xf32> to vector<8xf32>
    %69 = vector.shape_cast %68 : vector<8xf32> to vector<8x1xf32>
    %70 = tpu.reciprocal %69 {approx = true} : vector<8x1xf32> -> vector<8x1xf32>
    %71 = vector.broadcast %70 : vector<8x1xf32> to vector<8x8xf32>
    %72 = arith.mulf %67, %71 : vector<8x8xf32>
    %73 = arith.truncf %72 : vector<8x8xf32> to vector<8x8xbf16>
    %74 = arith.truncf %57 : vector<8x32xf32> to vector<8x32xbf16>
    %cst_22 = arith.constant dense<0.000000e+00> : vector<8x32xf32>
    %75 = tpu.matmul %73, %74, %cst_22 {dimension_numbers = #tpu.dot_dimension_numbers<[1], [0], [0], [1], [0, 0, 1, 1], [], []>} : vector<8x8xbf16>, vector<8x32xbf16>, vector<8x32xf32> -> vector<8x32xf32>
    %76 = vector.extract_strided_slice %30 {offsets = [0, 64], sizes = [8, 32], strides = [1, 1]} : vector<16x384xf32> to vector<8x32xf32>
    %77 = vector.extract_strided_slice %30 {offsets = [0, 160], sizes = [8, 32], strides = [1, 1]} : vector<16x384xf32> to vector<8x32xf32>
    %78 = vector.extract_strided_slice %30 {offsets = [0, 256], sizes = [8, 32], strides = [1, 1]} : vector<16x384xf32> to vector<8x32xf32>
    %79 = arith.truncf %76 : vector<8x32xf32> to vector<8x32xbf16>
    %80 = arith.truncf %77 : vector<8x32xf32> to vector<8x32xbf16>
    %cst_23 = arith.constant dense<0.000000e+00> : vector<8x8xf32>
    %81 = tpu.matmul %79, %80, %cst_23 {dimension_numbers = #tpu.dot_dimension_numbers<[1], [1], [0], [0], [0, 0, 1, 0], [], []>} : vector<8x32xbf16>, vector<8x32xbf16>, vector<8x8xf32> -> vector<8x8xf32>
    %cst_24 = arith.constant 0xFF800000 : f32
    %82 = vector.broadcast %cst_24 : f32 to vector<8x8xf32>
    %83 = arith.select %33, %81, %82 : vector<8x8xi1>, vector<8x8xf32>
    %cst_25 = arith.constant dense<0xFF800000> : vector<8xf32>
    %84 = vector.multi_reduction <maximumf>, %83, %cst_25 [1] : vector<8x8xf32> to vector<8xf32>
    %85 = vector.shape_cast %84 : vector<8xf32> to vector<8x1xf32>
    %86 = vector.broadcast %85 : vector<8x1xf32> to vector<8x8xf32>
    %87 = arith.subf %83, %86 : vector<8x8xf32>
    %88 = math.exp %87 : vector<8x8xf32>
    %cst_26 = arith.constant dense<0.000000e+00> : vector<8xf32>
    %89 = vector.multi_reduction <add>, %88, %cst_26 [1] : vector<8x8xf32> to vector<8xf32>
    %90 = vector.shape_cast %89 : vector<8xf32> to vector<8x1xf32>
    %91 = tpu.reciprocal %90 {approx = true} : vector<8x1xf32> -> vector<8x1xf32>
    %92 = vector.broadcast %91 : vector<8x1xf32> to vector<8x8xf32>
    %93 = arith.mulf %88, %92 : vector<8x8xf32>
    %94 = arith.truncf %93 : vector<8x8xf32> to vector<8x8xbf16>
    %95 = arith.truncf %78 : vector<8x32xf32> to vector<8x32xbf16>
    %cst_27 = arith.constant dense<0.000000e+00> : vector<8x32xf32>
    %96 = tpu.matmul %94, %95, %cst_27 {dimension_numbers = #tpu.dot_dimension_numbers<[1], [0], [0], [1], [0, 0, 1, 1], [], []>} : vector<8x8xbf16>, vector<8x32xbf16>, vector<8x32xf32> -> vector<8x32xf32>
    %97 = tpu.concatenate %54, %75, %96 in 1 : vector<8x32xf32>, vector<8x32xf32>, vector<8x32xf32> -> vector<8x96xf32>
    %98 = vector.extract_strided_slice %30 {offsets = [8, 0], sizes = [8, 32], strides = [1, 1]} : vector<16x384xf32> to vector<8x32xf32>
    %99 = vector.extract_strided_slice %30 {offsets = [8, 96], sizes = [8, 32], strides = [1, 1]} : vector<16x384xf32> to vector<8x32xf32>
    %100 = vector.extract_strided_slice %30 {offsets = [8, 192], sizes = [8, 32], strides = [1, 1]} : vector<16x384xf32> to vector<8x32xf32>
    %101 = arith.truncf %98 : vector<8x32xf32> to vector<8x32xbf16>
    %102 = arith.truncf %99 : vector<8x32xf32> to vector<8x32xbf16>
    %cst_28 = arith.constant dense<0.000000e+00> : vector<8x8xf32>
    %103 = tpu.matmul %101, %102, %cst_28 {dimension_numbers = #tpu.dot_dimension_numbers<[1], [1], [0], [0], [0, 0, 1, 0], [], []>} : vector<8x32xbf16>, vector<8x32xbf16>, vector<8x8xf32> -> vector<8x8xf32>
    %cst_29 = arith.constant 0xFF800000 : f32
    %104 = vector.broadcast %cst_29 : f32 to vector<8x8xf32>
    %105 = arith.select %33, %103, %104 : vector<8x8xi1>, vector<8x8xf32>
    %cst_30 = arith.constant dense<0xFF800000> : vector<8xf32>
    %106 = vector.multi_reduction <maximumf>, %105, %cst_30 [1] : vector<8x8xf32> to vector<8xf32>
    %107 = vector.shape_cast %106 : vector<8xf32> to vector<8x1xf32>
    %108 = vector.broadcast %107 : vector<8x1xf32> to vector<8x8xf32>
    %109 = arith.subf %105, %108 : vector<8x8xf32>
    %110 = math.exp %109 : vector<8x8xf32>
    %cst_31 = arith.constant dense<0.000000e+00> : vector<8xf32>
    %111 = vector.multi_reduction <add>, %110, %cst_31 [1] : vector<8x8xf32> to vector<8xf32>
    %112 = vector.shape_cast %111 : vector<8xf32> to vector<8x1xf32>
    %113 = tpu.reciprocal %112 {approx = true} : vector<8x1xf32> -> vector<8x1xf32>
    %114 = vector.broadcast %113 : vector<8x1xf32> to vector<8x8xf32>
    %115 = arith.mulf %110, %114 : vector<8x8xf32>
    %116 = arith.truncf %115 : vector<8x8xf32> to vector<8x8xbf16>
    %117 = arith.truncf %100 : vector<8x32xf32> to vector<8x32xbf16>
    %cst_32 = arith.constant dense<0.000000e+00> : vector<8x32xf32>
    %118 = tpu.matmul %116, %117, %cst_32 {dimension_numbers = #tpu.dot_dimension_numbers<[1], [0], [0], [1], [0, 0, 1, 1], [], []>} : vector<8x8xbf16>, vector<8x32xbf16>, vector<8x32xf32> -> vector<8x32xf32>
    %119 = vector.extract_strided_slice %30 {offsets = [8, 32], sizes = [8, 32], strides = [1, 1]} : vector<16x384xf32> to vector<8x32xf32>
    %120 = vector.extract_strided_slice %30 {offsets = [8, 128], sizes = [8, 32], strides = [1, 1]} : vector<16x384xf32> to vector<8x32xf32>
    %121 = vector.extract_strided_slice %30 {offsets = [8, 224], sizes = [8, 32], strides = [1, 1]} : vector<16x384xf32> to vector<8x32xf32>
    %122 = arith.truncf %119 : vector<8x32xf32> to vector<8x32xbf16>
    %123 = arith.truncf %120 : vector<8x32xf32> to vector<8x32xbf16>
    %cst_33 = arith.constant dense<0.000000e+00> : vector<8x8xf32>
    %124 = tpu.matmul %122, %123, %cst_33 {dimension_numbers = #tpu.dot_dimension_numbers<[1], [1], [0], [0], [0, 0, 1, 0], [], []>} : vector<8x32xbf16>, vector<8x32xbf16>, vector<8x8xf32> -> vector<8x8xf32>
    %cst_34 = arith.constant 0xFF800000 : f32
    %125 = vector.broadcast %cst_34 : f32 to vector<8x8xf32>
    %126 = arith.select %33, %124, %125 : vector<8x8xi1>, vector<8x8xf32>
    %cst_35 = arith.constant dense<0xFF800000> : vector<8xf32>
    %127 = vector.multi_reduction <maximumf>, %126, %cst_35 [1] : vector<8x8xf32> to vector<8xf32>
    %128 = vector.shape_cast %127 : vector<8xf32> to vector<8x1xf32>
    %129 = vector.broadcast %128 : vector<8x1xf32> to vector<8x8xf32>
    %130 = arith.subf %126, %129 : vector<8x8xf32>
    %131 = math.exp %130 : vector<8x8xf32>
    %cst_36 = arith.constant dense<0.000000e+00> : vector<8xf32>
    %132 = vector.multi_reduction <add>, %131, %cst_36 [1] : vector<8x8xf32> to vector<8xf32>
    %133 = vector.shape_cast %132 : vector<8xf32> to vector<8x1xf32>
    %134 = tpu.reciprocal %133 {approx = true} : vector<8x1xf32> -> vector<8x1xf32>
    %135 = vector.broadcast %134 : vector<8x1xf32> to vector<8x8xf32>
    %136 = arith.mulf %131, %135 : vector<8x8xf32>
    %137 = arith.truncf %136 : vector<8x8xf32> to vector<8x8xbf16>
    %138 = arith.truncf %121 : vector<8x32xf32> to vector<8x32xbf16>
    %cst_37 = arith.constant dense<0.000000e+00> : vector<8x32xf32>
    %139 = tpu.matmul %137, %138, %cst_37 {dimension_numbers = #tpu.dot_dimension_numbers<[1], [0], [0], [1], [0, 0, 1, 1], [], []>} : vector<8x8xbf16>, vector<8x32xbf16>, vector<8x32xf32> -> vector<8x32xf32>
    %140 = vector.extract_strided_slice %30 {offsets = [8, 64], sizes = [8, 32], strides = [1, 1]} : vector<16x384xf32> to vector<8x32xf32>
    %141 = vector.extract_strided_slice %30 {offsets = [8, 160], sizes = [8, 32], strides = [1, 1]} : vector<16x384xf32> to vector<8x32xf32>
    %142 = vector.extract_strided_slice %30 {offsets = [8, 256], sizes = [8, 32], strides = [1, 1]} : vector<16x384xf32> to vector<8x32xf32>
    %143 = arith.truncf %140 : vector<8x32xf32> to vector<8x32xbf16>
    %144 = arith.truncf %141 : vector<8x32xf32> to vector<8x32xbf16>
    %cst_38 = arith.constant dense<0.000000e+00> : vector<8x8xf32>
    %145 = tpu.matmul %143, %144, %cst_38 {dimension_numbers = #tpu.dot_dimension_numbers<[1], [1], [0], [0], [0, 0, 1, 0], [], []>} : vector<8x32xbf16>, vector<8x32xbf16>, vector<8x8xf32> -> vector<8x8xf32>
    %cst_39 = arith.constant 0xFF800000 : f32
    %146 = vector.broadcast %cst_39 : f32 to vector<8x8xf32>
    %147 = arith.select %33, %145, %146 : vector<8x8xi1>, vector<8x8xf32>
    %cst_40 = arith.constant dense<0xFF800000> : vector<8xf32>
    %148 = vector.multi_reduction <maximumf>, %147, %cst_40 [1] : vector<8x8xf32> to vector<8xf32>
    %149 = vector.shape_cast %148 : vector<8xf32> to vector<8x1xf32>
    %150 = vector.broadcast %149 : vector<8x1xf32> to vector<8x8xf32>
    %151 = arith.subf %147, %150 : vector<8x8xf32>
    %152 = math.exp %151 : vector<8x8xf32>
    %cst_41 = arith.constant dense<0.000000e+00> : vector<8xf32>
    %153 = vector.multi_reduction <add>, %152, %cst_41 [1] : vector<8x8xf32> to vector<8xf32>
    %154 = vector.shape_cast %153 : vector<8xf32> to vector<8x1xf32>
    %155 = tpu.reciprocal %154 {approx = true} : vector<8x1xf32> -> vector<8x1xf32>
    %156 = vector.broadcast %155 : vector<8x1xf32> to vector<8x8xf32>
    %157 = arith.mulf %152, %156 : vector<8x8xf32>
    %158 = arith.truncf %157 : vector<8x8xf32> to vector<8x8xbf16>
    %159 = arith.truncf %142 : vector<8x32xf32> to vector<8x32xbf16>
    %cst_42 = arith.constant dense<0.000000e+00> : vector<8x32xf32>
    %160 = tpu.matmul %158, %159, %cst_42 {dimension_numbers = #tpu.dot_dimension_numbers<[1], [0], [0], [1], [0, 0, 1, 1], [], []>} : vector<8x8xbf16>, vector<8x32xbf16>, vector<8x32xf32> -> vector<8x32xf32>
    %161 = tpu.concatenate %118, %139, %160 in 1 : vector<8x32xf32>, vector<8x32xf32>, vector<8x32xf32> -> vector<8x96xf32>
    %162 = tpu.concatenate %97, %161 in 0 : vector<8x96xf32>, vector<8x96xf32> -> vector<16x96xf32>
    %163 = arith.truncf %162 : vector<16x96xf32> to vector<16x96xbf16>
    %c0_43 = arith.constant 0 : index
    %c0_44 = arith.constant 0 : index
    %164 = vector.load %arg5[%c0_43, %c0_44] : memref<96x128xbf16, #tpu.memory_space<vmem>>, vector<96x128xbf16>
    %cst_45 = arith.constant dense<0.000000e+00> : vector<16x128xf32>
    %165 = tpu.matmul %163, %164, %cst_45 {dimension_numbers = #tpu.dot_dimension_numbers<[1], [0], [0], [1], [0, 0, 1, 1], [], []>} : vector<16x96xbf16>, vector<96x128xbf16>, vector<16x128xf32> -> vector<16x128xf32>
    %c0_46 = arith.constant 0 : index
    %c0_47 = arith.constant 0 : index
    %166 = vector.load %arg6[%c0_46, %c0_47] : memref<1x128xf32, #tpu.memory_space<vmem>>, vector<1x128xf32>
    %167 = vector.broadcast %166 : vector<1x128xf32> to vector<16x128xf32>
    %168 = arith.addf %165, %167 : vector<16x128xf32>
    %169 = arith.addf %0, %168 : vector<16x128xf32>
    %c0_48 = arith.constant 0 : index
    %c0_49 = arith.constant 0 : index
    %170 = vector.load %arg7[%c0_48, %c0_49] : memref<1x128xf32, #tpu.memory_space<vmem>>, vector<1x128xf32>
    %c0_50 = arith.constant 0 : index
    %c0_51 = arith.constant 0 : index
    %171 = vector.load %arg8[%c0_50, %c0_51] : memref<1x128xf32, #tpu.memory_space<vmem>>, vector<1x128xf32>
    %cst_52 = arith.constant dense<0.000000e+00> : vector<16xf32>
    %172 = vector.multi_reduction <add>, %169, %cst_52 [1] : vector<16x128xf32> to vector<16xf32>
    %173 = vector.shape_cast %172 : vector<16xf32> to vector<16x1xf32>
    %cst_53 = arith.constant 0.010416667 : f32
    %174 = vector.broadcast %cst_53 : f32 to vector<16x1xf32>
    %175 = arith.mulf %173, %174 : vector<16x1xf32>
    %176 = vector.broadcast %175 : vector<16x1xf32> to vector<16x128xf32>
    %177 = arith.subf %169, %176 : vector<16x128xf32>
    %178 = tpu.iota {dimensions = array<i32: 1>} : vector<16x128xi32>
    %c96_i32_54 = arith.constant 96 : i32
    %179 = vector.broadcast %c96_i32_54 : i32 to vector<16x128xi32>
    %180 = arith.cmpi slt, %178, %179 : vector<16x128xi32>
    %cst_55 = arith.constant 0.000000e+00 : f32
    %181 = vector.broadcast %cst_55 : f32 to vector<16x128xf32>
    %182 = arith.select %180, %177, %181 : vector<16x128xi1>, vector<16x128xf32>
    %183 = arith.mulf %182, %182 : vector<16x128xf32>
    %cst_56 = arith.constant dense<0.000000e+00> : vector<16xf32>
    %184 = vector.multi_reduction <add>, %183, %cst_56 [1] : vector<16x128xf32> to vector<16xf32>
    %185 = vector.shape_cast %184 : vector<16xf32> to vector<16x1xf32>
    %cst_57 = arith.constant 0.010416667 : f32
    %186 = vector.broadcast %cst_57 : f32 to vector<16x1xf32>
    %187 = arith.mulf %185, %186 : vector<16x1xf32>
    %cst_58 = arith.constant 9.99999974E-6 : f32
    %188 = vector.broadcast %cst_58 : f32 to vector<16x1xf32>
    %189 = arith.addf %187, %188 : vector<16x1xf32>
    %190 = math.rsqrt %189 : vector<16x1xf32>
    %191 = vector.broadcast %190 : vector<16x1xf32> to vector<16x128xf32>
    %192 = arith.mulf %182, %191 : vector<16x128xf32>
    %193 = vector.broadcast %170 : vector<1x128xf32> to vector<16x128xf32>
    %194 = arith.mulf %192, %193 : vector<16x128xf32>
    %195 = vector.broadcast %171 : vector<1x128xf32> to vector<16x128xf32>
    %196 = arith.addf %194, %195 : vector<16x128xf32>
    %197 = arith.truncf %196 : vector<16x128xf32> to vector<16x128xbf16>
    %c0_59 = arith.constant 0 : index
    %c0_60 = arith.constant 0 : index
    %198 = vector.load %arg9[%c0_59, %c0_60] : memref<128x384xbf16, #tpu.memory_space<vmem>>, vector<128x384xbf16>
    %cst_61 = arith.constant dense<0.000000e+00> : vector<16x384xf32>
    %199 = tpu.matmul %197, %198, %cst_61 {dimension_numbers = #tpu.dot_dimension_numbers<[1], [0], [0], [1], [0, 0, 1, 1], [], []>} : vector<16x128xbf16>, vector<128x384xbf16>, vector<16x384xf32> -> vector<16x384xf32>
    %c0_62 = arith.constant 0 : index
    %c0_63 = arith.constant 0 : index
    %200 = vector.load %arg10[%c0_62, %c0_63] : memref<1x384xf32, #tpu.memory_space<vmem>>, vector<1x384xf32>
    %201 = vector.broadcast %200 : vector<1x384xf32> to vector<16x384xf32>
    %202 = arith.addf %199, %201 : vector<16x384xf32>
    %cst_64 = arith.constant 0.000000e+00 : f32
    %203 = vector.broadcast %cst_64 : f32 to vector<16x384xf32>
    %204 = arith.maximumf %202, %203 : vector<16x384xf32>
    %205 = arith.truncf %204 : vector<16x384xf32> to vector<16x384xbf16>
    %c0_65 = arith.constant 0 : index
    %c0_66 = arith.constant 0 : index
    %206 = vector.load %arg11[%c0_65, %c0_66] : memref<384x128xbf16, #tpu.memory_space<vmem>>, vector<384x128xbf16>
    %cst_67 = arith.constant dense<0.000000e+00> : vector<16x128xf32>
    %207 = tpu.matmul %205, %206, %cst_67 {dimension_numbers = #tpu.dot_dimension_numbers<[1], [0], [0], [1], [0, 0, 1, 1], [], []>} : vector<16x384xbf16>, vector<384x128xbf16>, vector<16x128xf32> -> vector<16x128xf32>
    %c0_68 = arith.constant 0 : index
    %c0_69 = arith.constant 0 : index
    %208 = vector.load %arg12[%c0_68, %c0_69] : memref<1x128xf32, #tpu.memory_space<vmem>>, vector<1x128xf32>
    %209 = vector.broadcast %208 : vector<1x128xf32> to vector<16x128xf32>
    %210 = arith.addf %207, %209 : vector<16x128xf32>
    %211 = arith.addf %169, %210 : vector<16x128xf32>
    %c0_70 = arith.constant 0 : index
    %c0_71 = arith.constant 0 : index
    %212 = vector.load %arg13[%c0_70, %c0_71] : memref<16x128xf32, #tpu.memory_space<vmem>>, vector<16x128xf32>
    tpu.vector_store %arg13[%c0_70, %c0_71], %211 {strides = array<i32>} : memref<16x128xf32, #tpu.memory_space<vmem>>, vector<16x128xf32>,
    return
  }
  func.func @transform_0(%arg0: i32) -> (i32, i32) {
    %c0_i32 = arith.constant 0 : i32
    %c0_i32_0 = arith.constant 0 : i32
    return %arg0, %c0_i32 : i32, i32
  }
  func.func @transform_1(%arg0: i32) -> (i32, i32) {
    %c0_i32 = arith.constant 0 : i32
    %c0_i32_0 = arith.constant 0 : i32
    %c0_i32_1 = arith.constant 0 : i32
    return %c0_i32, %c0_i32_0 : i32, i32
  }
  func.func @transform_2(%arg0: i32) -> (i32, i32) {
    %c0_i32 = arith.constant 0 : i32
    %c0_i32_0 = arith.constant 0 : i32
    %c0_i32_1 = arith.constant 0 : i32
    return %c0_i32, %c0_i32_0 : i32, i32
  }
  func.func @transform_3(%arg0: i32) -> (i32, i32) {
    %c0_i32 = arith.constant 0 : i32
    %c0_i32_0 = arith.constant 0 : i32
    %c0_i32_1 = arith.constant 0 : i32
    return %c0_i32, %c0_i32_0 : i32, i32
  }
  func.func @transform_4(%arg0: i32) -> (i32, i32) {
    %c0_i32 = arith.constant 0 : i32
    %c0_i32_0 = arith.constant 0 : i32
    %c0_i32_1 = arith.constant 0 : i32
    return %c0_i32, %c0_i32_0 : i32, i32
  }
  func.func @transform_5(%arg0: i32) -> (i32, i32) {
    %c0_i32 = arith.constant 0 : i32
    %c0_i32_0 = arith.constant 0 : i32
    %c0_i32_1 = arith.constant 0 : i32
    return %c0_i32, %c0_i32_0 : i32, i32
  }
  func.func @transform_6(%arg0: i32) -> (i32, i32) {
    %c0_i32 = arith.constant 0 : i32
    %c0_i32_0 = arith.constant 0 : i32
    %c0_i32_1 = arith.constant 0 : i32
    return %c0_i32, %c0_i32_0 : i32, i32
  }
  func.func @transform_7(%arg0: i32) -> (i32, i32) {
    %c0_i32 = arith.constant 0 : i32
    %c0_i32_0 = arith.constant 0 : i32
    %c0_i32_1 = arith.constant 0 : i32
    return %c0_i32, %c0_i32_0 : i32, i32
  }
  func.func @transform_8(%arg0: i32) -> (i32, i32) {
    %c0_i32 = arith.constant 0 : i32
    %c0_i32_0 = arith.constant 0 : i32
    %c0_i32_1 = arith.constant 0 : i32
    return %c0_i32, %c0_i32_0 : i32, i32
  }
  func.func @transform_9(%arg0: i32) -> (i32, i32) {
    %c0_i32 = arith.constant 0 : i32
    %c0_i32_0 = arith.constant 0 : i32
    %c0_i32_1 = arith.constant 0 : i32
    return %c0_i32, %c0_i32_0 : i32, i32
  }
  func.func @transform_10(%arg0: i32) -> (i32, i32) {
    %c0_i32 = arith.constant 0 : i32
    %c0_i32_0 = arith.constant 0 : i32
    %c0_i32_1 = arith.constant 0 : i32
    return %c0_i32, %c0_i32_0 : i32, i32
  }
  func.func @transform_11(%arg0: i32) -> (i32, i32) {
    %c0_i32 = arith.constant 0 : i32
    %c0_i32_0 = arith.constant 0 : i32
    %c0_i32_1 = arith.constant 0 : i32
    return %c0_i32, %c0_i32_0 : i32, i32
  }
  func.func @transform_12(%arg0: i32) -> (i32, i32) {
    %c0_i32 = arith.constant 0 : i32
    %c0_i32_0 = arith.constant 0 : i32
    return %arg0, %c0_i32 : i32, i32
  }
}

</mosaic_0001>

<bundles_post_ra>
// kernel: tpu_custom_call.1
= control target key start
LH: loop header
LB: loop body
LE: loop exit
PB: predicated region body
PF: predicated region fallthrough
CT: control target
= control target key end

     0   :  { %17 = vsyncpa [#allocation3], 0  ;;  %s2771_s0 = inlined_call_operand.hbm [shape: f32[16,128], index: 0, kind: input, shape index: {}]   ;;  %s2772_s1 = inlined_call_operand.vmem [shape: f32[1,128], index: 1, kind: input, shape index: {}]   ;;  %s2773_s2 = inlined_call_operand.vmem [shape: f32[1,128], index: 2, kind: input, shape index: {}]   ;;  %s2774_s3 = inlined_call_operand.hbm [shape: bf16[128,384], index: 3, kind: input, shape index: {}]   ;;  %s2775_s4 = inlined_call_operand.hbm [shape: bf16[96,128], index: 4, kind: input, shape index: {}]   ;;  %s2776_s5 = inlined_call_operand.vmem [shape: f32[1,128], index: 5, kind: input, shape index: {}]   ;;  %s2777_s6 = inlined_call_operand.vmem [shape: f32[1,128], index: 6, kind: input, shape index: {}]   ;;  %s2778_s7 = inlined_call_operand.vmem [shape: f32[1,128], index: 7, kind: input, shape index: {}]   ;;  %s2779_s8 = inlined_call_operand.hbm [shape: bf16[128,384], index: 8, kind: input, shape index: {}]   ;;  %s2780_s9 = inlined_call_operand.vmem [shape: f32[1,384], index: 9, kind: input, shape index: {}]   ;;  %s2781_s10 = inlined_call_operand.hbm [shape: bf16[384,128], index: 10, kind: input, shape index: {}]   ;;  %s2782_s11 = inlined_call_operand.vmem [shape: f32[1,128], index: 11, kind: input, shape index: {}]   ;;  %s2783_s12 = inlined_call_operand.hbm [shape: f32[16,128], index: 12, kind: output, shape index: {}]  }
   0x1   :  { %18 = vsyncpa [#allocation6], 0 }
   0x2   :  { %19 = vsyncpa [#allocation9], 0 }
   0x3   :  { %20 = vsyncpa [#allocation4], 0  ;;  %s2422_s21 = smov [#allocation5]  }
   0x4   :  { %s42_s22 = sshll.u32 %s2422_s21, 4  ;;  %s43_s22 = int_to_ptr.vmem [resolvable:$true] %s42_s22 }
   0x5   :  { %s2302_s23 = scalar_lea.vmem %s43_s22, 3072  ;;  %p2307_p1 = scmp.lt.s32.totalorder %s43_s22, %s43_s22 }
   0x6   :  { %p2303_p0 = scmp.ne.s32.totalorder %s43_s22, %s2302_s23  ;;  %p2308_p2 = scmp.lt.s32.totalorder %s2302_s23, %s2302_s23 }
   0x8   :  { %p2309_p3 = por %p2308_p2, %p2307_p1 }
   0xa   :  { %p2310_p4 = pnand %p2309_p3, %p2303_p0 }
   0xc   :  { %2313 = shalt.err (!%p2310_p4)
}
   0xd   :  { %s2423_s24 = smov 192   ;;  %s2424_s25 = smov 12  }
   0xe   :  { %48 = dma.hbm_to_vmem [thread:$0]  %s2774_s3, 3072, %s43_s22, [#allocation6], %s2423_s24, %s2423_s24, %s2424_s25  }
   0xf   :  { %s2425_s28 = smov [#allocation8]   ;;  %s2426_s30 = smov [#allocation2]  }
  0x10   :  { %s72_s29 = sshll.u32 %s2425_s28, 4  ;;  %s26_s13 = sshll.u32 %s2426_s30, 4  ;;  %s73_s29 = int_to_ptr.vmem [resolvable:$true] %s72_s29  ;;  %s27_s13 = int_to_ptr.vmem [resolvable:$true] %s26_s13 }
  0x11   :  { %s2322_s14 = scalar_lea.vmem %s73_s29, 3072  ;;  %p2327_p6 = scmp.lt.s32.totalorder %s73_s29, %s73_s29 }
  0x12   :  { %p2323_p5 = scmp.ne.s32.totalorder %s73_s29, %s2322_s14  ;;  %p2328_p7 = scmp.lt.s32.totalorder %s2322_s14, %s2322_s14 }
  0x14   :  { %p2329_p8 = por %p2328_p7, %p2327_p6 }
  0x16   :  { %p2330_p9 = pnand %p2329_p8, %p2323_p5 }
  0x18   :  { %2333 = shalt.err (!%p2330_p9)
}
  0x19   :  { %78 = dma.hbm_to_vmem [thread:$0]  %s2779_s8, 3072, %s73_s29, [#allocation9], %s2423_s24, %s2423_s24, %s2424_s25  }
  0x1a   :  { %s2342_s17 = scalar_lea.vmem %s27_s13, 256  ;;  %p2347_p11 = scmp.lt.s32.totalorder %s27_s13, %s27_s13 }
  0x1b   :  { %p2343_p10 = scmp.ne.s32.totalorder %s27_s13, %s2342_s17  ;;  %p2348_p12 = scmp.lt.s32.totalorder %s2342_s17, %s2342_s17 }
  0x1d   :  { %p2349_p13 = por %p2348_p12, %p2347_p11 }
  0x1f   :  { %p2350_p0 = pnand %p2349_p13, %p2343_p10 }
  0x21   :  { %2353 = shalt.err (!%p2350_p0)
}
  0x22   :  { %s2427_s3 = smov 128   ;;  %s2428_s18 = smov 8  }
  0x23   :  { %32 = dma.hbm_to_vmem [thread:$0]  %s2771_s0, 256, %s27_s13, [#allocation3], %s2427_s3, %s2427_s3, %s2428_s18  }
  0x24   :  { %s2429_s21 = smov [#allocation7]  }
  0x25   :  { %s54_s22 = sshll.u32 %s2429_s21, 4  ;;  %s55_s22 = int_to_ptr.vmem [resolvable:$true] %s54_s22 }
  0x26   :  { %s2362_s8 = scalar_lea.vmem %s55_s22, 768  ;;  %p2367_p2 = scmp.lt.s32.totalorder %s55_s22, %s55_s22 }
  0x27   :  { %p2363_p1 = scmp.ne.s32.totalorder %s55_s22, %s2362_s8  ;;  %p2368_p3 = scmp.lt.s32.totalorder %s2362_s8, %s2362_s8 }
  0x29   :  { %p2369_p4 = por %p2368_p3, %p2367_p2 }
  0x2b   :  { %p2370_p5 = pnand %p2369_p4, %p2363_p1 }
  0x2d   :  { %2373 = shalt.err (!%p2370_p5)
}
  0x2e   :  { %s2430_s23 = smov 64   ;;  %s2431_s24 = smov 4  }
  0x2f   :  { %60 = dma.hbm_to_vmem [thread:$0]  %s2775_s4, 768, %s55_s22, [#allocation6], %s2430_s23, %s2430_s23, %s2431_s24  }
  0x30   :  { %s2432_s27 = smov [#allocation10]  }
  0x31   :  { %s86_s0 = sshll.u32 %s2432_s27, 4  ;;  %s87_s0 = int_to_ptr.vmem [resolvable:$true] %s86_s0 }
  0x32   :  { %s2382_s28 = scalar_lea.vmem %s87_s0, 3072  ;;  %p2387_p7 = scmp.lt.s32.totalorder %s87_s0, %s87_s0 }
  0x33   :  { %p2383_p6 = scmp.ne.s32.totalorder %s87_s0, %s2382_s28  ;;  %p2388_p8 = scmp.lt.s32.totalorder %s2382_s28, %s2382_s28 }
  0x35   :  { %p2389_p9 = por %p2388_p8, %p2387_p7 }
  0x37   :  { %p2390_p10 = pnand %p2389_p9, %p2383_p6 }
  0x39   :  { %2393 = shalt.err (!%p2390_p10)
}
  0x3a   :  { %92 = dma.hbm_to_vmem [thread:$0]  %s2781_s10, 3072, %s87_s0, [#allocation9], %s2430_s23, %s2430_s23, %s2431_s24  }
  0x3b   :  { %2414 = dma.done.wait [#allocation3], 256  }
  0x3c   :  { %2415 = vsyncadd [#allocation3], 4294967040 }
  0x3d   :  { %2416 = dma.done.wait [#allocation6], 3840  }
  0x3e   :  { %2417 = vsyncadd [#allocation6], 4294963456 }
  0x3f   :  { %2418 = dma.done.wait [#allocation9], 6144  }
  0x40   :  { %2419 = vsyncadd [#allocation9], 4294961152  ;;  %v111_v0 = vld [vmem:[#allocation2] sm:$0xff]  ;;  %v112_v1 = vld [vmem:[#allocation2 + $0x8] sm:$0xff]  ;;  %v2433_v4 = vmov 0.0   ;;  %v123_v6 = vlaneseq  ;;  %v2434_v31 = vmov 0  }
  0x41   :  { %115 = vadd.xlane.f32.xlu0 %v111_v0  ;;  %v2166_v2 = vld [vmem:[#allocation5 + $0xac] ss:$12 sps:$4 sm:$0xff]   ;;  %v2168_v3 = vld [vmem:[#allocation5 + $0xa8] ss:$12 sps:$4 sm:$0xff]   ;;  %1991 = vmatprep.subr.bf16.mxu1 %v2433_v4  ;;  %v2169_v5 = vld [vmem:[#allocation5 + $0xb0] ss:$12 sps:$4 sm:$0xff]  }
  0x42   :  { %319 = vmatprep.subr.bf16.mxu0 %v2166_v2  ;;  %1992 = vmatpush3.bf16.msra.mxu1 %v2169_v5  ;;  %v2529_v7 = vand.u32 127, %v123_v6  ;;  %v2170_v18 = vld [vmem:[#allocation5 + $0x94] ss:$12 sps:$4 sm:$0xff]   ;;  %v2172_v19 = vld [vmem:[#allocation5 + $0x90] ss:$12 sps:$4 sm:$0xff]   ;;  %vm2435_vm1 = vmmov 0  }
  0x43   :  { %320 = vmatpush1.bf16.msra.mxu0 %v2168_v3  ;;  %1993 = vmatprep.subr.bf16.mxu1 %v2433_v4  ;;  %v2173_v20 = vld [vmem:[#allocation5 + $0x98] ss:$12 sps:$4 sm:$0xff]   ;;  %v2174_v21 = vld [vmem:[#allocation5 + $0x7c] ss:$12 sps:$4 sm:$0xff]   ;;  %v2177_v23 = vld [vmem:[#allocation5 + $0x80] ss:$12 sps:$4 sm:$0xff]  }
  0x44   :  { %vm125_vm0 = vcmp.lt.s32.totalorder %v2529_v7, 96  ;;  %321 = vmatprep.subr.bf16.mxu0 %v2170_v18  ;;  %v2176_v22 = vld [vmem:[#allocation5 + $0x78] ss:$12 sps:$4 sm:$0xff]   ;;  %v2180_v25 = vld [vmem:[#allocation5 + $0x60] ss:$12 sps:$4 sm:$0xff]   ;;  %351 = vmatprep.mubr.bf16.mxu0 %v2434_v31  ;;  %vm410_vm2 = vcmask 261120  }
  0x45   :  { %117 = vadd.xlane.f32.xlu0 %v112_v1  ;;  %v2178_v24 = vld [vmem:[#allocation5 + $0x64] ss:$12 sps:$4 sm:$0xff]   ;;  %v2181_v26 = vld [vmem:[#allocation5 + $0x68] ss:$12 sps:$4 sm:$0xff]   ;;  %v2182_v27 = vld [vmem:[#allocation5 + $0x4c] ss:$12 sps:$4 sm:$0xff]   ;;  %2007 = vmatprep.mubr.msk.bf16.mxu1 %vm2435_vm1, %v2433_v4 }
  0x46   :  { %1994 = vmatpush3.bf16.msra.mxu1 %v2173_v20  ;;  %v2184_v28 = vld [vmem:[#allocation5 + $0x48] ss:$12 sps:$4 sm:$0xff]   ;;  %v2185_v29 = vld [vmem:[#allocation5 + $0x50] ss:$12 sps:$4 sm:$0xff]   ;;  %v2189_v33 = vld [vmem:[#allocation5 + $0x38] ss:$12 sps:$4 sm:$0xff]  }
  0x47   :  { %322 = vmatpush1.bf16.msra.mxu0 %v2172_v19  ;;  %1995 = vmatprep.subr.bf16.mxu1 %v2433_v4  ;;  %v2186_v30 = vld [vmem:[#allocation5 + $0x34] ss:$12 sps:$4 sm:$0xff]   ;;  %v2188_v32 = vld [vmem:[#allocation5 + $0x30] ss:$12 sps:$4 sm:$0xff]   ;;  %v2192_v35 = vld [vmem:[#allocation5 + $0x18] ss:$12 sps:$4 sm:$0xff]  }
  0x48   :  { %323 = vmatprep.subr.bf16.mxu0 %v2174_v21  ;;  %v2190_v34 = vld [vmem:[#allocation5 + $0x1c] ss:$12 sps:$4 sm:$0xff]   ;;  %v2193_v36 = vld [vmem:[#allocation5 + $0x20] ss:$12 sps:$4 sm:$0xff]   ;;  %v2194_v37 = vld [vmem:[#allocation5 + $0x4] ss:$12 sps:$4 sm:$0xff]  }
  0x49   :  { %v2196_v38 = vld [vmem:[#allocation5] ss:$12 sps:$4 sm:$0xff]   ;;  %v2197_v39 = vld [vmem:[#allocation5 + $0x8] ss:$12 sps:$4 sm:$0xff]   ;;  %v1814_v48 = vld [vmem:[%s2772_s1] ss:$0 sm:$0xff] }
  0x4a   :  { %1996 = vmatpush3.bf16.msra.mxu1 %v2177_v23  ;;  %v1815_v52 = vld [vmem:[%s2773_s2] ss:$0 sm:$0xff]  ;;  %s2436_s1 = smov 96   ;;  %s2437_s2 = smov 32   ;;  %vm458_vm4 = vcmask 64512   ;;  %vm478_vm5 = vcmask 1043456  }
  0x4b   :  { %324 = vmatpush1.bf16.msra.mxu0 %v2176_v22  ;;  %1997 = vmatprep.subr.bf16.mxu1 %v2433_v4  ;;  %v2614_v22 = vshrl.u32 %v123_v6, 7  ;;  %vm750_vm6 = vcmask 523264   ;;  %vm1150_vm7 = vcmask 785408   ;;  %s2438_s22 = smov [#allocation11]  }
  0x4c   :  { %325 = vmatprep.subr.bf16.mxu0 %v2178_v24  ;;  %s1800_s8 = sshll.u32 %s2438_s22, 4  ;;  %s1801_s8 = int_to_ptr.vmem [resolvable:$true] %s1800_s8 }
  0x4d   :  { %vm2618_vm3 = vcmp.le.s32.totalorder %v2529_v7, %v2614_v22  ;;  %v2216_v7 = vld [vmem:[#allocation8 + $0x60] ss:$12 sps:$4 sm:$0xff]   ;;  %p2399_p12 = scmp.lt.s32.totalorder %s1801_s8, %s1801_s8 }
  0x4e   :  { %1998 = vmatpush3.bf16.msra.mxu1 %v2181_v26 }
  0x4f   :  { %326 = vmatpush1.bf16.msra.mxu0 %v2180_v25  ;;  %1999 = vmatprep.subr.bf16.mxu1 %v2433_v4 }
  0x50   :  { %327 = vmatprep.subr.bf16.mxu0 %v2182_v27 }
  0x52   :  { %2000 = vmatpush3.bf16.msra.mxu1 %v2185_v29 }
  0x53   :  { %328 = vmatpush1.bf16.msra.mxu0 %v2184_v28  ;;  %2001 = vmatprep.subr.bf16.mxu1 %v2433_v4 }
  0x54   :  { %329 = vmatprep.subr.bf16.mxu0 %v2186_v30 }
  0x56   :  { %2002 = vmatpush3.bf16.msra.mxu1 %v2189_v33 }
  0x57   :  { %330 = vmatpush1.bf16.msra.mxu0 %v2188_v32  ;;  %2003 = vmatprep.subr.bf16.mxu1 %v2433_v4 }
  0x58   :  { %331 = vmatprep.subr.bf16.mxu0 %v2190_v34 }
  0x5a   :  { %2004 = vmatpush3.bf16.msra.mxu1 %v2193_v36 }
  0x5b   :  { %332 = vmatpush1.bf16.msra.mxu0 %v2192_v35  ;;  %2005 = vmatprep.subr.bf16.mxu1 %v2433_v4 }
  0x5c   :  { %333 = vmatprep.subr.bf16.mxu0 %v2194_v37 }
  0x5e   :  { %2006 = vmatpush3.bf16.msra.mxu1 %v2197_v39 }
  0x5f   :  { %334 = vmatpush1.bf16.msra.mxu0 %v2196_v38  ;;  %2011 = vmatprep.subr.bf16.mxu1 %v2433_v4 }
  0x60   :  { %2023 = vmatprep.subr.bf16.mxu0 %v2433_v4 }
  0xca   :  { %v116_v8 = vpop.xlane.xlu0 %115 }
  0xcb   :  { %v119_v9 = vmul.f32 0.010416667, %v116_v8 }
  0xcd   :  { %v121_v10 = vsub.f32 %v111_v0, %v119_v9 }
  0xce   :  { %v118_v11 = vpop.xlane.xlu0 %117 }
  0xcf   :  { %v120_v12 = vmul.f32 0.010416667, %v118_v11  ;;  %v2534_v13 = vsel %vm125_vm0, %v121_v10, 0.0 }
  0xd0   :  { %v128_v14 = vmul.f32 %v2534_v13, %v2534_v13 }
  0xd1   :  { %v122_v15 = vsub.f32 %v112_v1, %v120_v12 }
  0xd2   :  { %130 = vadd.xlane.f32.xlu1 %v128_v14 }
  0xd3   :  { %v2540_v16 = vsel %vm125_vm0, %v122_v15, 0.0 }
  0xd4   :  { %v129_v17 = vmul.f32 %v2540_v16, %v2540_v16 }
  0xd6   :  { %132 = vadd.xlane.f32.xlu1 %v129_v17 }
 0x15b   :  { %v131_v40 = vpop.xlane.xlu1 %130 }
 0x15c   :  { %v134_v41 = vmul.f32 0.010416667, %v131_v40 }
 0x15e   :  { %v136_v42 = vadd.f32 1e-05, %v134_v41 }
 0x15f   :  { %v133_v43 = vpop.xlane.xlu1 %132 }
 0x160   :  { %2260 = vrsqrt.f32 %v136_v42  ;;  %v135_v44 = vmul.f32 0.010416667, %v133_v43 }
 0x162   :  { %v137_v45 = vadd.f32 1e-05, %v135_v44 }
 0x164   :  { %2262 = vrsqrt.f32 %v137_v45 }
 0x16d   :  { %v2261_v46 = vpop.eup %2260 }
 0x16e   :  { %v140_v47 = vmul.f32 %v2261_v46, %v2534_v13 }
 0x170   :  { %v148_v51 = vmul.f32 %v1814_v48, %v140_v47 }
 0x171   :  { %v2263_v49 = vpop.eup %2262 }
 0x172   :  { %v141_v50 = vmul.f32 %v2263_v49, %v2540_v16  ;;  %v156_v54 = vadd.f32 %v1815_v52, %v148_v51 }
 0x174   :  { %v149_v53 = vmul.f32 %v1814_v48, %v141_v50 }
 0x176   :  { %v157_v55 = vadd.f32 %v1815_v52, %v149_v53 }
 0x178   :  { %v158_v56 = vpack.c.bf16 %v157_v55, %v156_v54 }
 0x17a   :  { %352 = vmatmul.mubr.bf16.vlgmr.msra.gmra.mxu0 %v158_v56  ;;  %2008 = vmatmul.mubr.bf16.vlgmr.msra.gmra.mxu1 %v158_v56 }
 0x17b   :  { %2025 = vmatprep.mubr.msk.bf16.mxu0 %vm2435_vm1, %v2433_v4  ;;  %2013 = vmatprep.mubr.msk.bf16.mxu1 %vm2435_vm1, %v2433_v4 }
 0x23a   :  { %v353_v57 = vpop.f32.mrf.mxu0  ;;  %v2567_v58 = vpop.f32.mrf.mxu1 }
 0x23b   :  { %v406_v59 = vpack.c.bf16 %v353_v57, %v353_v57 }
 0x23c   :  { %v355_v60 = vpop.f32.mrf.mxu0  ;;  %v2009_v61 = vpop.f32.mrf.mxu1 }
 0x23d   :  { %v2569_v62 = vpack.c.bf16 %v355_v60, %v355_v60  ;;  %522 = vrot.lane.b32.xlu1 %v406_v59, %s2436_s1  ;;  %408 = vrot.lane.b32.xlu0 %v406_v59, %s2437_s2 }
 0x23e   :  { %v357_v63 = vpop.f32.mrf.mxu0  ;;  %v2572_v0 = vpop.f32.mrf.mxu1 }
 0x23f   :  { %v752_v1 = vpack.c.bf16 %v357_v63, %v357_v63  ;;  %v528_v2 = vsel %vm410_vm2, %v2569_v62, 0 }
 0x240   :  { %v359_v3 = vpop.f32.mrf.mxu0  ;;  %v2010_v5 = vpop.f32.mrf.mxu1  ;;  %2024 = vmatpush3.bf16.xpose.msra.mxu0 %v528_v2 }
 0x241   :  { %633 = vrot.lane.b32.xlu1 %v2569_v62, %s2436_s1  ;;  %754 = vrot.lane.b32.xlu0 %v752_v1, %s2437_s2  ;;  %v2579_v8 = vpack.c.bf16 %v359_v3, %v359_v3 }
 0x242   :  { %2035 = vmatprep.subr.bf16.mxu0 %v2433_v4 }
 0x243   :  { %v871_v17 = vsel %vm410_vm2, %v2579_v8, 0 }
 0x245   :  { %631 = vrot.lane.b32.xlu1 %v406_v59, %s2430_s23  ;;  %976 = vrot.lane.b32.xlu0 %v2579_v8, %s2436_s1 }
 0x249   :  { %865 = vrot.lane.b32.xlu1 %v752_v1, %s2436_s1 }
 0x24d   :  { %974 = vrot.lane.b32.xlu1 %v752_v1, %s2430_s23 }
 0x2af   :  { %v523_v9 = vpop.permute.xlu1 %522  ;;  %v409_v10 = vpop.permute.xlu0 %408 }
 0x2b0   :  { %v415_v11 = vsel %vm410_vm2, %v409_v10, 0  ;;  %2026 = vmatmul.mubr.msk.bf16.vlgmr.msra.gmra.mxu0 %vm410_vm2, %v523_v9 }
 0x2b1   :  { %2012 = vmatpush3.bf16.xpose.msra.mxu1 %v415_v11  ;;  %2037 = vmatprep.mubr.msk.bf16.mxu0 %vm2435_vm1, %v2433_v4 }
 0x2b2   :  { %2017 = vmatprep.subr.bf16.mxu1 %v2433_v4 }
 0x2b3   :  { %v634_v12 = vpop.permute.xlu1 %633  ;;  %v755_v14 = vpop.permute.xlu0 %754 }
 0x2b4   :  { %v639_v13 = vsel %vm410_vm2, %v634_v12, 0  ;;  %v760_v16 = vsel %vm410_vm2, %v755_v14, 0 }
 0x2b5   :  { %2036 = vmatpush3.bf16.xpose.msra.mxu0 %v639_v13 }
 0x2b6   :  { %2047 = vmatprep.subr.bf16.mxu0 %v2433_v4 }
 0x2b7   :  { %v632_v15 = vpop.permute.xlu1 %631  ;;  %v977_v18 = vpop.permute.xlu0 %976 }
 0x2b8   :  { %2014 = vmatmul.mubr.msk.bf16.vlgmr.msra.gmra.mxu1 %vm410_vm2, %v406_v59  ;;  %v982_v20 = vsel %vm410_vm2, %v977_v18, 0 }
 0x2b9   :  { %2019 = vmatprep.mubr.msk.bf16.mxu1 %vm2435_vm1, %v2433_v4 }
 0x2bb   :  { %v866_v19 = vpop.permute.xlu1 %865 }
 0x2bc   :  { %2038 = vmatmul.mubr.msk.bf16.vlgmr.msra.gmra.mxu0 %vm410_vm2, %v632_v15 }
 0x2bd   :  { %2048 = vmatpush3.bf16.xpose.msra.mxu0 %v760_v16  ;;  %2049 = vmatprep.mubr.msk.bf16.mxu0 %vm2435_vm1, %v2433_v4 }
 0x2be   :  { %2059 = vmatprep.subr.bf16.mxu0 %v2433_v4 }
 0x2bf   :  { %v975_v21 = vpop.permute.xlu1 %974 }
 0x2c4   :  { %2050 = vmatmul.mubr.msk.bf16.vlgmr.msra.gmra.mxu0 %vm410_vm2, %v752_v1 }
 0x2c5   :  { %2060 = vmatpush3.bf16.xpose.msra.mxu0 %v871_v17  ;;  %2061 = vmatprep.mubr.msk.bf16.mxu0 %vm2435_vm1, %v2433_v4 }
 0x2c6   :  { %2071 = vmatprep.subr.bf16.mxu0 %v2433_v4 }
 0x2cc   :  { %2062 = vmatmul.mubr.msk.bf16.vlgmr.msra.gmra.mxu0 %vm410_vm2, %v866_v19 }
 0x2cd   :  { %2072 = vmatpush3.bf16.xpose.msra.mxu0 %v982_v20  ;;  %2073 = vmatprep.mubr.msk.bf16.mxu0 %vm2435_vm1, %v2433_v4 }
 0x2ce   :  { %2083 = vmatprep.subr.bf16.mxu0 %v2433_v4 }
 0x2d4   :  { %2074 = vmatmul.mubr.msk.bf16.vlgmr.msra.gmra.mxu0 %vm410_vm2, %v975_v21 }
 0x2d5   :  { %2095 = vmatprep.mubr.msk.bf16.mxu0 %vm2435_vm1, %v2433_v4 }
 0x370   :  { %v564_v24 = vpop.f32.mrf.mxu0 }
 0x371   :  { %v570_v25 = vsel %vm2618_vm3, %v564_v24, -inf }
 0x372   :  { %v2027_v26 = vpop.f32.mrf.mxu0  ;;  %v571_v27 = vsel %vm458_vm4, %v570_v25, -inf }
 0x373   :  { %572 = vmax.xlane.f32.xlu1 %v571_v27 }
 0x374   :  { %v567_v28 = vpop.f32.mrf.mxu0 }
 0x376   :  { %v2028_v29 = vpop.f32.mrf.mxu0 }
 0x378   :  { %v451_v30 = vpop.f32.mrf.mxu1 }
 0x379   :  { %v457_v6 = vsel %vm2618_vm3, %v451_v30, -inf }
 0x37a   :  { %v2015_v32 = vpop.f32.mrf.mxu1  ;;  %v459_v33 = vsel %vm458_vm4, %v457_v6, -inf }
 0x37b   :  { %460 = vmax.xlane.f32.xlu0 %v459_v33 }
 0x37c   :  { %v454_v34 = vpop.f32.mrf.mxu1  ;;  %v675_v35 = vpop.f32.mrf.mxu0 }
 0x37d   :  { %v681_v36 = vsel %vm2618_vm3, %v675_v35, -inf }
 0x37e   :  { %v2016_v37 = vpop.f32.mrf.mxu1  ;;  %v2039_v38 = vpop.f32.mrf.mxu0  ;;  %v682_v39 = vsel %vm458_vm4, %v681_v36, -inf }
 0x37f   :  { %683 = vmax.xlane.f32.xlu0 %v682_v39 }
 0x380   :  { %v678_v40 = vpop.f32.mrf.mxu0 }
 0x382   :  { %v2040_v41 = vpop.f32.mrf.mxu0 }
 0x384   :  { %v796_v42 = vpop.f32.mrf.mxu0 }
 0x385   :  { %v802_v43 = vsel %vm2618_vm3, %v796_v42, -inf }
 0x386   :  { %v2051_v44 = vpop.f32.mrf.mxu0  ;;  %v803_v45 = vsel %vm458_vm4, %v802_v43, -inf }
 0x387   :  { %804 = vmax.xlane.f32.xlu0 %v803_v45  ;;  %v694_v45 = vpack.c.bf16 %v2567_v58, %v2567_v58 }
 0x388   :  { %v799_v46 = vpop.f32.mrf.mxu0 }
 0x38a   :  { %v2052_v47 = vpop.f32.mrf.mxu0 }
 0x38c   :  { %v907_v48 = vpop.f32.mrf.mxu0 }
 0x38d   :  { %v913_v49 = vsel %vm2618_vm3, %v907_v48, -inf }
 0x38e   :  { %v2063_v50 = vpop.f32.mrf.mxu0  ;;  %v914_v51 = vsel %vm458_vm4, %v913_v49, -inf }
 0x38f   :  { %915 = vmax.xlane.f32.xlu0 %v914_v51 }
 0x390   :  { %v910_v52 = vpop.f32.mrf.mxu0 }
 0x392   :  { %v2064_v53 = vpop.f32.mrf.mxu0 }
 0x394   :  { %v1018_v54 = vpop.f32.mrf.mxu0 }
 0x395   :  { %v1024_v55 = vsel %vm2618_vm3, %v1018_v54, -inf }
 0x396   :  { %v2075_v56 = vpop.f32.mrf.mxu0  ;;  %v1025_v57 = vsel %vm458_vm4, %v1024_v55, -inf }
 0x397   :  { %1026 = vmax.xlane.f32.xlu1 %v1025_v57 }
 0x398   :  { %v1021_v59 = vpop.f32.mrf.mxu0 }
 0x39a   :  { %v2076_v60 = vpop.f32.mrf.mxu0 }
 0x3fc   :  { %v573_v61 = vpop.xlane.xlu1 %572 }
 0x3fd   :  { %v574_v63 = vsub.f32 %v570_v25, %v573_v61  ;;  %v1037_v61 = vpack.c.bf16 %v2572_v0, %v2572_v0 }
 0x3ff   :  { %v575_v1 = vmul.f32 1.442695, %v574_v63 }
 0x401   :  { %2264 = vpow2.f32 %v575_v1  ;;  %v1042_v1 = vsel %vm478_vm5, %v1037_v61, 0  ;;  %v2204_v61 = vld [vmem:[#allocation8 + $0xa8] ss:$12 sps:$4 sm:$0xff]  }
 0x404   :  { %v461_v2 = vpop.xlane.xlu0 %460 }
 0x405   :  { %v462_v3 = vsub.f32 %v457_v6, %v461_v2 }
 0x407   :  { %v463_v5 = vmul.f32 1.442695, %v462_v3 }
 0x408   :  { %v684_v9 = vpop.xlane.xlu0 %683 }
 0x409   :  { %2266 = vpow2.f32 %v463_v5  ;;  %v685_v10 = vsub.f32 %v681_v36, %v684_v9 }
 0x40b   :  { %v686_v11 = vmul.f32 1.442695, %v685_v10 }
 0x40d   :  { %2268 = vpow2.f32 %v686_v11 }
 0x40e   :  { %v2265_v12 = vpop.eup %2264 }
 0x40f   :  { %v577_v13 = vsel %vm458_vm4, %v2265_v12, 0.0 }
 0x410   :  { %v805_v14 = vpop.xlane.xlu0 %804  ;;  %578 = vadd.xlane.f32.xlu1 %v577_v13 }
 0x411   :  { %v806_v15 = vsub.f32 %v802_v43, %v805_v14 }
 0x413   :  { %v807_v16 = vmul.f32 1.442695, %v806_v15 }
 0x415   :  { %2270 = vpow2.f32 %v807_v16 }
 0x416   :  { %v2267_v17 = vpop.eup %2266 }
 0x417   :  { %v465_v18 = vsel %vm458_vm4, %v2267_v17, 0.0 }
 0x418   :  { %466 = vadd.xlane.f32.xlu0 %v465_v18  ;;  %v916_v19 = vpop.xlane.xlu0 %915 }
 0x419   :  { %v917_v20 = vsub.f32 %v913_v49, %v916_v19  ;;  %v699_v49 = vsel %vm478_vm5, %v694_v45, 0 }
 0x41a   :  { %v2269_v21 = vpop.eup %2268 }
 0x41b   :  { %v918_v23 = vmul.f32 1.442695, %v917_v20  ;;  %v688_v24 = vsel %vm458_vm4, %v2269_v21, 0.0 }
 0x41c   :  { %689 = vadd.xlane.f32.xlu0 %v688_v24 }
 0x41d   :  { %2272 = vpow2.f32 %v918_v23  ;;  %v2198_v23 = vld [vmem:[#allocation7 + $0x28] sm:$0xff]  }
 0x41e   :  { %2084 = vmatpush3.bf16.msra.mxu0 %v2198_v23  ;;  %v2219_v23 = vld [vmem:[#allocation8 + $0x68] ss:$12 sps:$4 sm:$0xff]  }
 0x41f   :  { %2085 = vmatprep.subr.bf16.mxu0 %v2433_v4 }
 0x420   :  { %v1027_v29 = vpop.xlane.xlu1 %1026 }
 0x421   :  { %v1028_v30 = vsub.f32 %v1024_v55, %v1027_v29 }
 0x422   :  { %v2271_v25 = vpop.eup %2270 }
 0x423   :  { %v809_v26 = vsel %vm458_vm4, %v2271_v25, 0.0  ;;  %v1029_v6 = vmul.f32 1.442695, %v1028_v30 }
 0x424   :  { %810 = vadd.xlane.f32.xlu1 %v809_v26 }
 0x425   :  { %2274 = vpow2.f32 %v1029_v6  ;;  %v2201_v6 = vld [vmem:[#allocation7 + $0x10] sm:$0xff]  }
 0x42a   :  { %v2644_v27 = vpop.eup %2272 }
 0x42b   :  { %v920_v28 = vsel %vm458_vm4, %v2644_v27, 0.0 }
 0x42c   :  { %921 = vadd.xlane.f32.xlu1 %v920_v28 }
 0x432   :  { %473 = vrot.lane.b32.xlu0 %v2569_v62, %s2430_s23  ;;  %v2656_v32 = vpop.eup %2274 }
 0x433   :  { %v1031_v33 = vsel %vm458_vm4, %v2656_v32, 0.0 }
 0x436   :  { %817 = vrot.lane.b32.xlu0 %v2579_v8, %s2430_s23 }
 0x43a   :  { %926 = vrot.lane.b32.xlu0 %v2579_v8, %s2437_s2 }
 0x43d   :  { %583 = vrot.lane.b32.xlu1 %v2569_v62, %s2437_s2 }
 0x461   :  { %1032 = vadd.xlane.f32.xlu1 %v1031_v33 }
 0x499   :  { %v579_v35 = vpop.xlane.xlu1 %578 }
 0x4a1   :  { %v467_v34 = vpop.xlane.xlu0 %466 }
 0x4a2   :  { %2276 = vrcp.f32 %v467_v34  ;;  %v2202_v34 = vld [vmem:[#allocation7 + $0x8] sm:$0xff]  }
 0x4a3   :  { %2278 = vrcp.f32 %v579_v35  ;;  %v2203_v35 = vld [vmem:[#allocation7] sm:$0xff]  }
 0x4a5   :  { %v690_v36 = vpop.xlane.xlu0 %689 }
 0x4a6   :  { %2280 = vrcp.f32 %v690_v36 }
 0x4a9   :  { %v474_v8 = vpop.permute.xlu0 %473 }
 0x4aa   :  { %v480_v37 = vsel %vm478_vm5, %v474_v8, 0 }
 0x4ab   :  { %2018 = vmatpush3.bf16.msra.mxu1 %v480_v37 }
 0x4ac   :  { %2029 = vmatprep.subr.bf16.mxu1 %v2433_v4 }
 0x4ad   :  { %v811_v39 = vpop.xlane.xlu1 %810  ;;  %v818_v58 = vpop.permute.xlu0 %817 }
 0x4ae   :  { %2282 = vrcp.f32 %v811_v39  ;;  %v823_v53 = vsel %vm478_vm5, %v818_v58, 0 }
 0x4af   :  { %v2277_v62 = vpop.eup %2276 }
 0x4b0   :  { %v469_v38 = vmul.f32 %v2277_v62, %v2267_v17  ;;  %v2279_v41 = vpop.eup %2278 }
 0x4b1   :  { %v581_v43 = vmul.f32 %v2279_v41, %v2265_v12  ;;  %v927_v55 = vpop.permute.xlu0 %926 }
 0x4b2   :  { %v470_v40 = vpack.c.bf16 %v469_v38, %v469_v38  ;;  %v932_v59 = vsel %vm478_vm5, %v927_v55, 0 }
 0x4b3   :  { %v582_v47 = vpack.c.bf16 %v581_v43, %v581_v43  ;;  %v2281_v48 = vpop.eup %2280 }
 0x4b4   :  { %2020 = vmatmul.mubr.msk.bf16.vlgmr.msra.gmra.mxu1 %vm458_vm4, %v470_v40  ;;  %v692_v50 = vmul.f32 %v2281_v48, %v2269_v21 }
 0x4b5   :  { %v922_v42 = vpop.xlane.xlu1 %921  ;;  %2031 = vmatprep.mubr.msk.bf16.mxu1 %vm2435_vm1, %v2433_v4 }
 0x4b6   :  { %2284 = vrcp.f32 %v922_v42  ;;  %v693_v51 = vpack.c.bf16 %v692_v50, %v692_v50  ;;  %v1852_v50 = vld [vmem:[%s2776_s5] ss:$0 sm:$0xff] }
 0x4b9   :  { %v584_v44 = vpop.permute.xlu1 %583 }
 0x4ba   :  { %v589_v46 = vsel %vm478_vm5, %v584_v44, 0 }
 0x4bb   :  { %2030 = vmatpush3.bf16.msra.mxu1 %v589_v46  ;;  %v2283_v52 = vpop.eup %2282 }
 0x4bc   :  { %2041 = vmatprep.subr.bf16.mxu1 %v2433_v4  ;;  %v813_v54 = vmul.f32 %v2283_v52, %v2271_v25  ;;  %v2199_v25 = vld [vmem:[#allocation7 + $0x20] sm:$0xff]  }
 0x4bd   :  { %2086 = vmatpush3.bf16.msra.mxu0 %v2199_v25  ;;  %v2220_v25 = vld [vmem:[#allocation8 + $0x48] ss:$12 sps:$4 sm:$0xff]  }
 0x4be   :  { %2032 = vmatmul.mubr.msk.bf16.vlgmr.msra.gmra.mxu1 %vm458_vm4, %v582_v47  ;;  %v814_v56 = vpack.c.bf16 %v813_v54, %v813_v54  ;;  %2087 = vmatprep.subr.bf16.mxu0 %v2433_v4 }
 0x4bf   :  { %2042 = vmatpush3.bf16.msra.mxu1 %v699_v49  ;;  %2043 = vmatprep.mubr.msk.bf16.mxu1 %vm2435_vm1, %v2433_v4 }
 0x4c0   :  { %2053 = vmatprep.subr.bf16.mxu1 %v2433_v4 }
 0x4c3   :  { %v2285_v57 = vpop.eup %2284 }
 0x4c4   :  { %v924_v60 = vmul.f32 %v2285_v57, %v2644_v27  ;;  %v2200_v27 = vld [vmem:[#allocation7 + $0x18] sm:$0xff]  }
 0x4c5   :  { %2088 = vmatpush3.bf16.msra.mxu0 %v2200_v27  ;;  %v2224_v27 = vld [vmem:[#allocation8 + $0x30] ss:$12 sps:$4 sm:$0xff]  }
 0x4c6   :  { %2044 = vmatmul.mubr.msk.bf16.vlgmr.msra.gmra.mxu1 %vm458_vm4, %v693_v51  ;;  %v925_v63 = vpack.c.bf16 %v924_v60, %v924_v60  ;;  %2089 = vmatprep.subr.bf16.mxu0 %v2433_v4 }
 0x4c7   :  { %2054 = vmatpush3.bf16.msra.mxu1 %v823_v53  ;;  %2055 = vmatprep.mubr.msk.bf16.mxu1 %vm2435_vm1, %v2433_v4  ;;  %v2292_v53 = vld [vmem:[#allocation2] sm:$0xff] }
 0x4c8   :  { %2065 = vmatprep.subr.bf16.mxu1 %v2433_v4 }
 0x4c9   :  { %2090 = vmatpush3.bf16.msra.mxu0 %v2201_v6  ;;  %v2231_v6 = vld [vmem:[#allocation8 + $0x20] ss:$12 sps:$4 sm:$0xff]  }
 0x4ca   :  { %2091 = vmatprep.subr.bf16.mxu0 %v2433_v4 }
 0x4cd   :  { %2092 = vmatpush3.bf16.msra.mxu0 %v2202_v34  ;;  %v2235_v34 = vld [vmem:[#allocation8 + $0x8] ss:$12 sps:$4 sm:$0xff]  }
 0x4ce   :  { %2056 = vmatmul.mubr.msk.bf16.vlgmr.msra.gmra.mxu1 %vm458_vm4, %v814_v56  ;;  %2093 = vmatprep.subr.bf16.mxu0 %v2433_v4 }
 0x4cf   :  { %2066 = vmatpush3.bf16.msra.mxu1 %v932_v59  ;;  %2067 = vmatprep.mubr.msk.bf16.mxu1 %vm2435_vm1, %v2433_v4  ;;  %v2293_v59 = vld [vmem:[#allocation2 + $0x8] sm:$0xff] }
 0x4d0   :  { %2077 = vmatprep.subr.bf16.mxu1 %v2433_v4 }
 0x4d1   :  { %2094 = vmatpush3.bf16.msra.mxu0 %v2203_v35  ;;  %v2237_v35 = vld [vmem:[#allocation10 + $0x78] sm:$0xff]  }
 0x4d2   :  { %2099 = vmatprep.subr.bf16.mxu0 %v2433_v4 }
 0x4d6   :  { %2068 = vmatmul.mubr.msk.bf16.vlgmr.msra.gmra.mxu1 %vm458_vm4, %v925_v63  ;;  %v2206_v63 = vld [vmem:[#allocation8 + $0xac] ss:$12 sps:$4 sm:$0xff]  }
 0x4d7   :  { %2078 = vmatpush3.bf16.msra.mxu1 %v1042_v1  ;;  %2079 = vmatprep.mubr.msk.bf16.mxu1 %vm2435_vm1, %v2433_v4  ;;  %v2207_v1 = vld [vmem:[#allocation8 + $0xb0] ss:$12 sps:$4 sm:$0xff]  }
 0x4d8   :  { %1417 = vmatprep.subr.bf16.mxu1 %v2206_v63  ;;  %v2245_v63 = vld [vmem:[#allocation10 + $0xa0] sm:$0xff]  }
 0x4ea   :  { %v1033_v2 = vpop.xlane.xlu1 %1032 }
 0x4eb   :  { %2286 = vrcp.f32 %v1033_v2 }
 0x4f8   :  { %v2287_v3 = vpop.eup %2286 }
 0x4f9   :  { %v1035_v5 = vmul.f32 %v2287_v3, %v2656_v32 }
 0x4fb   :  { %v1036_v9 = vpack.c.bf16 %v1035_v5, %v1035_v5 }
 0x4fd   :  { %2080 = vmatmul.mubr.msk.bf16.vlgmr.msra.gmra.mxu1 %vm458_vm4, %v1036_v9 }
 0x4fe   :  { %1449 = vmatprep.mubr.bf16.mxu1 %v2434_v31  ;;  %1418 = vmatpush1.bf16.msra.mxu1 %v2204_v61  ;;  %v2246_v61 = vld [vmem:[#allocation10 + $0x60] sm:$0xff]  }
 0x574   :  { %v516_v0 = vpop.f32.mrf.mxu1 }
 0x576   :  { %v2021_v10 = vpop.f32.mrf.mxu1 }
 0x578   :  { %v519_v11 = vpop.f32.mrf.mxu1 }
 0x57a   :  { %v2022_v12 = vpop.f32.mrf.mxu1 }
 0x57e   :  { %v625_v13 = vpop.f32.mrf.mxu1 }
 0x580   :  { %v2033_v14 = vpop.f32.mrf.mxu1 }
 0x582   :  { %v628_v15 = vpop.f32.mrf.mxu1 }
 0x583   :  { %v2210_v15 = vld [vmem:[#allocation8 + $0x94] ss:$12 sps:$4 sm:$0xff]  }
 0x584   :  { %v2034_v16 = vpop.f32.mrf.mxu1  ;;  %1419 = vmatprep.subr.bf16.mxu1 %v2210_v15  ;;  %v2258_v15 = vld [vmem:[#allocation10 + $0x40] sm:$0xff]  }
 0x585   :  { %v2208_v16 = vld [vmem:[#allocation8 + $0x90] ss:$12 sps:$4 sm:$0xff]  }
 0x586   :  { %v735_v17 = vpop.f32.mrf.mxu1  ;;  %1420 = vmatpush1.bf16.msra.mxu1 %v2208_v16  ;;  %v2259_v16 = vld [vmem:[#allocation10] sm:$0xff]  }
 0x588   :  { %v2045_v18 = vpop.f32.mrf.mxu1 }
 0x589   :  { %v2214_v18 = vld [vmem:[#allocation8 + $0x7c] ss:$12 sps:$4 sm:$0xff]  }
 0x58a   :  { %v738_v19 = vpop.f32.mrf.mxu1  ;;  %1421 = vmatprep.subr.bf16.mxu1 %v2214_v18  ;;  %v1272_v18 = vld [vmem:[%s2780_s9] sm:$0x7] }
 0x58b   :  { %v2212_v19 = vld [vmem:[#allocation8 + $0x78] ss:$12 sps:$4 sm:$0xff]  }
 0x58c   :  { %v2046_v20 = vpop.f32.mrf.mxu1  ;;  %1422 = vmatpush1.bf16.msra.mxu1 %v2212_v19  ;;  %v1280_v19 = vsub.s32 1, %v2614_v22 }
 0x58d   :  { %v2215_v20 = vld [vmem:[#allocation8 + $0x80] ss:$12 sps:$4 sm:$0xff]  }
 0x58e   :  { %v859_v21 = vpop.f32.mrf.mxu1 }
 0x590   :  { %v2057_v24 = vpop.f32.mrf.mxu1 }
 0x591   :  { %v2222_v24 = vld [vmem:[#allocation8 + $0x4c] ss:$12 sps:$4 sm:$0xff]  }
 0x592   :  { %v862_v31 = vpop.f32.mrf.mxu1 }
 0x593   :  { %v2223_v31 = vld [vmem:[#allocation8 + $0x50] ss:$12 sps:$4 sm:$0xff]  }
 0x594   :  { %v2058_v26 = vpop.f32.mrf.mxu1 }
 0x595   :  { %v2226_v26 = vld [vmem:[#allocation8 + $0x34] ss:$12 sps:$4 sm:$0xff]  }
 0x596   :  { %v968_v28 = vpop.f32.mrf.mxu1 }
 0x597   :  { %v2156_v29 = vpack.i.bf16 %v968_v28, %v625_v13  ;;  %v2227_v28 = vld [vmem:[#allocation8 + $0x38] ss:$12 sps:$4 sm:$0xff]  }
 0x598   :  { %v2069_v30 = vpop.f32.mrf.mxu1 }
 0x599   :  { %2157 = vrot.lane.b32.xlu0 %v2156_v29, %s2437_s2  ;;  %v2230_v29 = vld [vmem:[#allocation8 + $0x1c] ss:$12 sps:$4 sm:$0xff]   ;;  %v2228_v30 = vld [vmem:[#allocation8 + $0x18] ss:$12 sps:$4 sm:$0xff]  }
 0x59a   :  { %v971_v32 = vpop.f32.mrf.mxu1 }
 0x59b   :  { %v2234_v32 = vld [vmem:[#allocation8 + $0x4] ss:$12 sps:$4 sm:$0xff]  }
 0x59c   :  { %v2070_v33 = vpop.f32.mrf.mxu1 }
 0x59d   :  { %v2232_v33 = vld [vmem:[#allocation8] ss:$12 sps:$4 sm:$0xff]  }
 0x5bd   :  { %v1078_v36 = vpop.f32.mrf.mxu1 }
 0x5be   :  { %v2161_v8 = vpack.i.bf16 %v1078_v36, %v735_v17  ;;  %v2211_v17 = vld [vmem:[#allocation8 + $0x98] ss:$12 sps:$4 sm:$0xff]  }
 0x5bf   :  { %v2081_v37 = vpop.f32.mrf.mxu1 }
 0x5c0   :  { %2162 = vrot.lane.b32.xlu0 %v2161_v8, %s2430_s23 }
 0x5c1   :  { %v1081_v62 = vpop.f32.mrf.mxu1 }
 0x5c3   :  { %v2082_v38 = vpop.f32.mrf.mxu1 }
 0x60b   :  { %v2158_v39 = vpop.permute.xlu0 %2157 }
 0x60c   :  { %v2160_v40 = vunpack.i.h.bf16 %v2158_v39  ;;  %v2159_v41 = vunpack.i.l.bf16 %v2158_v39 }
 0x60e   :  { %v1092_v45 = vsel %vm410_vm2, %v859_v21, %v2160_v40  ;;  %v749_v46 = vsel %vm410_vm2, %v516_v0, %v2159_v41  ;;  %v2218_v21 = vld [vmem:[#allocation8 + $0x64] ss:$12 sps:$4 sm:$0xff]  }
 0x60f   :  { %1423 = vmatprep.subr.bf16.mxu1 %v2218_v21 }
 0x610   :  { %1424 = vmatpush1.bf16.msra.mxu1 %v2216_v7 }
 0x611   :  { %1425 = vmatprep.subr.bf16.mxu1 %v2222_v24 }
 0x614   :  { %1426 = vmatpush1.bf16.msra.mxu1 %v2220_v25 }
 0x615   :  { %1427 = vmatprep.subr.bf16.mxu1 %v2226_v26 }
 0x618   :  { %1428 = vmatpush1.bf16.msra.mxu1 %v2224_v27 }
 0x619   :  { %1429 = vmatprep.subr.bf16.mxu1 %v2230_v29 }
 0x61c   :  { %1430 = vmatpush1.bf16.msra.mxu1 %v2228_v30 }
 0x61d   :  { %1431 = vmatprep.subr.bf16.mxu1 %v2234_v32 }
 0x620   :  { %1432 = vmatpush1.bf16.msra.mxu1 %v2232_v33 }
 0x621   :  { %1960 = vmatprep.subr.bf16.mxu1 %v2237_v35 }
 0x632   :  { %v2163_v42 = vpop.permute.xlu0 %2162 }
 0x633   :  { %v2165_v43 = vunpack.i.h.bf16 %v2163_v42  ;;  %v2164_v44 = vunpack.i.l.bf16 %v2163_v42  ;;  %v1860_v42 = vld [vmem:[%s2777_s6] ss:$0 sm:$0xff] }
 0x635   :  { %v1093_v47 = vsel %vm750_vm6, %v1092_v45, %v2165_v43  ;;  %v751_v48 = vsel %vm750_vm6, %v749_v46, %v2164_v44  ;;  %v1861_v46 = vld [vmem:[%s2778_s7] ss:$0 sm:$0xff] }
 0x636   :  { %v1094_v49 = vpack.c.bf16 %v1093_v47, %v751_v48 }
 0x638   :  { %2096 = vmatmul.mubr.msk.bf16.vlgmr.msra.gmra.mxu0 %vm1150_vm7, %v1094_v49 }
 0x639   :  { %2115 = vmatprep.mubr.msk.bf16.mxu0 %vm2435_vm1, %v2433_v4  ;;  %2100 = vmatpush3.bf16.msra.mxu0 %v2207_v1  ;;  %v2247_v1 = vld [vmem:[#allocation10 + $0x20] sm:$0xff]  }
 0x63a   :  { %2101 = vmatprep.subr.bf16.mxu0 %v2433_v4 }
 0x63d   :  { %2102 = vmatpush3.bf16.msra.mxu0 %v2211_v17  ;;  %v1284_v17 = vsub.s32 2, %v2614_v22 }
 0x63e   :  { %2103 = vmatprep.subr.bf16.mxu0 %v2433_v4 }
 0x63f   :  { %v1285_v7 = vrot.slane %v1272_v18, %v1284_v17 }
 0x641   :  { %2104 = vmatpush3.bf16.msra.mxu0 %v2215_v20  ;;  %v1276_v20 = vsub.s32 0, %v2614_v22 }
 0x642   :  { %2105 = vmatprep.subr.bf16.mxu0 %v2433_v4 }
 0x643   :  { %v1277_v24 = vrot.slane %v1272_v18, %v1276_v20 }
 0x645   :  { %2106 = vmatpush3.bf16.msra.mxu0 %v2219_v23  ;;  %v1281_v23 = vrot.slane %v1272_v18, %v1280_v19 }
 0x646   :  { %2107 = vmatprep.subr.bf16.mxu0 %v2433_v4 }
 0x649   :  { %2108 = vmatpush3.bf16.msra.mxu0 %v2223_v31 }
 0x64a   :  { %2109 = vmatprep.subr.bf16.mxu0 %v2433_v4 }
 0x64d   :  { %2110 = vmatpush3.bf16.msra.mxu0 %v2227_v28 }
 0x64e   :  { %2111 = vmatprep.subr.bf16.mxu0 %v2433_v4 }
 0x651   :  { %2112 = vmatpush3.bf16.msra.mxu0 %v2231_v6 }
 0x652   :  { %2113 = vmatprep.subr.bf16.mxu0 %v2433_v4 }
 0x655   :  { %2114 = vmatpush3.bf16.msra.mxu0 %v2235_v34 }
 0x656   :  { %2119 = vmatprep.subr.bf16.mxu0 %v2433_v4 }
 0x6f8   :  { %v1188_v58 = vpop.f32.mrf.mxu0 }
 0x6f9   :  { %v1189_v51 = vadd.f32 %v1852_v50, %v1188_v58  ;;  %v2238_v58 = vld [vmem:[#allocation10 + $0x38] sm:$0xff]  }
 0x6fa   :  { %v2097_v52 = vpop.f32.mrf.mxu0 }
 0x6fb   :  { %v2709_v54 = vadd.f32 %v2292_v53, %v1189_v51  ;;  %v2240_v52 = vld [vmem:[#allocation10 + $0x70] sm:$0xff]  }
 0x6fc   :  { %v1191_v55 = vpop.f32.mrf.mxu0  ;;  %v2239_v53 = vld [vmem:[#allocation10 + $0xb0] sm:$0xff]  }
 0x6fd   :  { %v1192_v56 = vadd.f32 %v1852_v50, %v1191_v55  ;;  %1199 = vadd.xlane.f32.xlu0 %v2709_v54  ;;  %v2236_v50 = vld [vmem:[#allocation10 + $0xb8] sm:$0xff]   ;;  %v2241_v55 = vld [vmem:[#allocation10 + $0x30] sm:$0xff]  }
 0x6fe   :  { %v2098_v57 = vpop.f32.mrf.mxu0 }
 0x6ff   :  { %v2712_v60 = vadd.f32 %v2293_v59, %v1192_v56  ;;  %v2243_v56 = vld [vmem:[#allocation10 + $0x68] sm:$0xff]  }
 0x700   :  { %v2242_v57 = vld [vmem:[#allocation10 + $0xa8] sm:$0xff]  }
 0x701   :  { %1201 = vadd.xlane.f32.xlu1 %v2712_v60  ;;  %v2244_v59 = vld [vmem:[#allocation10 + $0x28] sm:$0xff]  }
 0x786   :  { %v1200_v2 = vpop.xlane.xlu0 %1199 }
 0x787   :  { %v1203_v3 = vmul.f32 0.010416667, %v1200_v2  ;;  %v2249_v2 = vld [vmem:[#allocation10 + $0x58] sm:$0xff]  }
 0x789   :  { %v1205_v5 = vsub.f32 %v2709_v54, %v1203_v3  ;;  %v2248_v3 = vld [vmem:[#allocation10 + $0x98] sm:$0xff]  }
 0x78a   :  { %v1202_v9 = vpop.xlane.xlu1 %1201 }
 0x78b   :  { %v1204_v0 = vmul.f32 0.010416667, %v1202_v9  ;;  %v2719_v10 = vsel %vm125_vm0, %v1205_v5, 0.0  ;;  %v2250_v5 = vld [vmem:[#allocation10 + $0x18] sm:$0xff]   ;;  %v2251_v9 = vld [vmem:[#allocation10 + $0x90] sm:$0xff]  }
 0x78c   :  { %v1209_v11 = vmul.f32 %v2719_v10, %v2719_v10 }
 0x78d   :  { %v1206_v12 = vsub.f32 %v2712_v60, %v1204_v0  ;;  %v2252_v0 = vld [vmem:[#allocation10 + $0x50] sm:$0xff]  }
 0x78e   :  { %1211 = vadd.xlane.f32.xlu1 %v1209_v11  ;;  %v2254_v11 = vld [vmem:[#allocation10 + $0x88] sm:$0xff]  }
 0x78f   :  { %v2726_v13 = vsel %vm125_vm0, %v1206_v12, 0.0  ;;  %v2255_v12 = vld [vmem:[#allocation10 + $0x48] sm:$0xff]  }
 0x790   :  { %v1210_v14 = vmul.f32 %v2726_v13, %v2726_v13 }
 0x792   :  { %1213 = vadd.xlane.f32.xlu1 %v1210_v14  ;;  %v2257_v14 = vld [vmem:[#allocation10 + $0x80] sm:$0xff]  }
 0x817   :  { %v1212_v36 = vpop.xlane.xlu1 %1211 }
 0x818   :  { %v1215_v8 = vmul.f32 0.010416667, %v1212_v36 }
 0x81a   :  { %v1217_v37 = vadd.f32 1e-05, %v1215_v8 }
 0x81b   :  { %v1214_v62 = vpop.xlane.xlu1 %1213 }
 0x81c   :  { %2288 = vrsqrt.f32 %v1217_v37  ;;  %v1216_v38 = vmul.f32 0.010416667, %v1214_v62 }
 0x81e   :  { %v1218_v39 = vadd.f32 1e-05, %v1216_v38 }
 0x820   :  { %2290 = vrsqrt.f32 %v1218_v39 }
 0x829   :  { %v2289_v40 = vpop.eup %2288 }
 0x82a   :  { %v1221_v41 = vmul.f32 %v2289_v40, %v2719_v10  ;;  %v2253_v10 = vld [vmem:[#allocation10 + $0x10] sm:$0xff]  }
 0x82c   :  { %v1229_v45 = vmul.f32 %v1860_v42, %v1221_v41 }
 0x82d   :  { %v2291_v43 = vpop.eup %2290 }
 0x82e   :  { %v1222_v44 = vmul.f32 %v2291_v43, %v2726_v13  ;;  %v1237_v48 = vadd.f32 %v1861_v46, %v1229_v45  ;;  %v2256_v13 = vld [vmem:[#allocation10 + $0x8] sm:$0xff]  }
 0x830   :  { %v1230_v47 = vmul.f32 %v1860_v42, %v1222_v44 }
 0x832   :  { %v1238_v49 = vadd.f32 %v1861_v46, %v1230_v47  ;;  %v1886_v46 = vld [vmem:[%s2782_s11] ss:$0 sm:$0xff]  ;;  %s2394_s11 = scalar_lea.vmem %s1801_s8, 256 }
 0x833   :  { %p2395_p11 = scmp.ne.s32.totalorder %s1801_s8, %s2394_s11  ;;  %p2400_p13 = scmp.lt.s32.totalorder %s2394_s11, %s2394_s11 }
 0x834   :  { %v1239_v51 = vpack.c.bf16 %v1238_v49, %v1237_v48 }
 0x835   :  { %p2401_p0 = por %p2400_p13, %p2399_p12 }
 0x836   :  { %1450 = vmatmul.mubr.bf16.vlgmr.msra.gmra.mxu1 %v1239_v51  ;;  %2116 = vmatmul.mubr.bf16.vlgmr.msra.gmra.mxu0 %v1239_v51 }
 0x837   :  { %2120 = vmatpush3.bf16.msra.mxu0 %v2236_v50  ;;  %1961 = vmatpush3.bf16.msra.mxu1 %v2238_v58  ;;  %p2402_p1 = pnand %p2401_p0, %p2395_p11 }
 0x838   :  { %2121 = vmatprep.subr.bf16.mxu0 %v2433_v4  ;;  %1962 = vmatprep.subr.bf16.mxu1 %v2240_v52 }
 0x839   :  { %2135 = vmatprep.mubr.msk.bf16.mxu0 %vm2435_vm1, %v2433_v4 }
 0x83b   :  { %2122 = vmatpush3.bf16.msra.mxu0 %v2239_v53  ;;  %1963 = vmatpush3.bf16.msra.mxu1 %v2241_v55 }
 0x83c   :  { %2123 = vmatprep.subr.bf16.mxu0 %v2433_v4  ;;  %1964 = vmatprep.subr.bf16.mxu1 %v2243_v56 }
 0x83f   :  { %2124 = vmatpush3.bf16.msra.mxu0 %v2242_v57  ;;  %1965 = vmatpush3.bf16.msra.mxu1 %v2244_v59 }
 0x840   :  { %2125 = vmatprep.subr.bf16.mxu0 %v2433_v4  ;;  %1966 = vmatprep.subr.bf16.mxu1 %v2246_v61 }
 0x843   :  { %2126 = vmatpush3.bf16.msra.mxu0 %v2245_v63  ;;  %1967 = vmatpush3.bf16.msra.mxu1 %v2247_v1 }
 0x844   :  { %2127 = vmatprep.subr.bf16.mxu0 %v2433_v4  ;;  %1968 = vmatprep.subr.bf16.mxu1 %v2249_v2 }
 0x847   :  { %2128 = vmatpush3.bf16.msra.mxu0 %v2248_v3  ;;  %1969 = vmatpush3.bf16.msra.mxu1 %v2250_v5 }
 0x848   :  { %2129 = vmatprep.subr.bf16.mxu0 %v2433_v4  ;;  %1970 = vmatprep.subr.bf16.mxu1 %v2252_v0 }
 0x84b   :  { %2130 = vmatpush3.bf16.msra.mxu0 %v2251_v9  ;;  %1971 = vmatpush3.bf16.msra.mxu1 %v2253_v10 }
 0x84c   :  { %2131 = vmatprep.subr.bf16.mxu0 %v2433_v4  ;;  %1972 = vmatprep.subr.bf16.mxu1 %v2255_v12 }
 0x84f   :  { %2132 = vmatpush3.bf16.msra.mxu0 %v2254_v11  ;;  %1973 = vmatpush3.bf16.msra.mxu1 %v2256_v13 }
 0x850   :  { %2133 = vmatprep.subr.bf16.mxu0 %v2433_v4  ;;  %1974 = vmatprep.subr.bf16.mxu1 %v2258_v15 }
 0x853   :  { %2134 = vmatpush3.bf16.msra.mxu0 %v2257_v14  ;;  %1975 = vmatpush3.bf16.msra.mxu1 %v2259_v16 }
 0x8f6   :  { %v1451_v4 = vpop.f32.mrf.mxu1  ;;  %v1494_v21 = vpop.f32.mrf.mxu0 }
 0x8f7   :  { %v1495_v26 = vadd.f32 %v1494_v21, %v1285_v7  ;;  %v1452_v32 = vadd.f32 %v1451_v4, %v1277_v24 }
 0x8f8   :  { %v1453_v25 = vpop.f32.mrf.mxu1  ;;  %v2117_v31 = vpop.f32.mrf.mxu0 }
 0x8f9   :  { %v1454_v29 = vadd.f32 %v1453_v25, %v1281_v23  ;;  %v1503_v35 = vmax.f32 %v1495_v26, 0.0  ;;  %v1501_v39 = vmax.f32 %v1452_v32, 0.0 }
 0x8fa   :  { %v1455_v27 = vpop.f32.mrf.mxu1  ;;  %v1497_v28 = vpop.f32.mrf.mxu0 }
 0x8fb   :  { %v1456_v30 = vadd.f32 %v1455_v27, %v1277_v24  ;;  %v1498_v6 = vadd.f32 %v1497_v28, %v1285_v7  ;;  %v1502_v37 = vmax.f32 %v1454_v29, 0.0 }
 0x8fc   :  { %v1457_v33 = vpop.f32.mrf.mxu1  ;;  %v2118_v34 = vpop.f32.mrf.mxu0 }
 0x8fd   :  { %v1506_v36 = vmax.f32 %v1498_v6, 0.0  ;;  %v1458_v8 = vadd.f32 %v1457_v33, %v1281_v23  ;;  %v1504_v22 = vmax.f32 %v1456_v30, 0.0 }
 0x8ff   :  { %v1509_v62 = vpack.c.bf16 %v1506_v36, %v1503_v35  ;;  %v1505_v38 = vmax.f32 %v1458_v8, 0.0  ;;  %v1507_v41 = vpack.c.bf16 %v1504_v22, %v1501_v39 }
 0x901   :  { %v1508_v40 = vpack.c.bf16 %v1505_v38, %v1502_v37  ;;  %2136 = vmatmul.mubr.bf16.vlgmr.msra.gmra.mxu0 %v1509_v62 }
 0x903   :  { %1741 = vmatprep.mubr.bf16.mxu1 %v1508_v40 }
 0x904   :  { %1742 = vmatmul.mubr.bf16.vlgmr.msra.gmra.mxu1 %v1507_v41 }
 0x9c1   :  { %v1784_v42 = vpop.f32.mrf.mxu0 }
 0x9c3   :  { %v2137_v43 = vpop.f32.mrf.mxu0 }
 0x9c4   :  { %v1976_v44 = vpop.f32.mrf.mxu1 }
 0x9c5   :  { %v1787_v45 = vpop.f32.mrf.mxu0 }
 0x9c6   :  { %v1977_v47 = vpop.f32.mrf.mxu1 }
 0x9c7   :  { %v1978_v48 = vadd.f32 %v1977_v47, %v1976_v44  ;;  %v2138_v49 = vpop.f32.mrf.mxu0 }
 0x9c8   :  { %v1979_v50 = vpop.f32.mrf.mxu1 }
 0x9c9   :  { %v1744_v58 = vadd.f32 %v1978_v48, %v1886_v46 }
 0x9ca   :  { %v1980_v51 = vpop.f32.mrf.mxu1 }
 0x9cb   :  { %v1785_v52 = vadd.f32 %v1784_v42, %v1744_v58  ;;  %v1981_v53 = vadd.f32 %v1980_v51, %v1979_v50 }
 0x9cd   :  { %v1747_v55 = vadd.f32 %v1981_v53, %v1886_v46  ;;  %v1791_v56 = vadd.f32 %v1785_v52, %v2709_v54 }
 0x9cf   :  { %v1788_v57 = vadd.f32 %v1787_v45, %v1747_v55  ;;  %1793 = vst [vmem:[#allocation11] sm:$0xff] %v1791_v56 }
 0x9d1   :  { %v1792_v59 = vadd.f32 %v1788_v57, %v2712_v60 }
 0x9d3   :  { %1794 = vst [vmem:[#allocation11 + $0x8] sm:$0xff] %v1792_v59 }
 0x9d4   :  { %2405 = shalt.err (!%p2402_p1)
}
 0x9d5   :  { %1806 = dma.vmem_to_hbm [thread:$0]  %s1801_s8, 256, %s2783_s12, [#allocation4], %s2427_s3, %s2427_s3, %s2428_s18  }
 0x9d6   :  { %2420 = dma.done.wait [#allocation4], 256  }
 0x9d7   :  { %2421 = vsyncadd [#allocation4], 4294967040 }
 0x9d8   :  { %1810 = vsyncpa [#allocation3], 1 }
 0x9d9   :  { %1811 = vsyncpa [#allocation6], 1 }
 0x9da   :  { %1812 = vsyncpa [#allocation9], 1 }
 0x9db   :  { %1813 = vsyncpa [#allocation4], 1 }

</bundles_post_ra>
